<compile_context>
chip_gen: v7x
topology: tpu7x:2x2x1
jax: 0.10.0
libtpu: 0.0.40
codegen_flags: <defaults>
</compile_context>

<pallas_src>
import jax
import jax.numpy as jnp
from jax.experimental import pallas as pl
from jax.experimental.pallas import tpu as pltpu

_LANES = 128
# Below this many elements the fixed pallas_call launch/pipeline overhead
# dominates; XLA's fused elementwise is strictly faster.
_SMALL_INPUT_ELEMS = 256 * 1024
# At least 2 grid steps per TensorCore on v7x megacore, and enough steps for
# the auto-pipeline to overlap DMA with compute everywhere.
_MIN_GRID_STEPS = 4
# Explicit scoped-VMEM limit: >= 4 MiB tiles double-buffered (in+out = 16 MiB)
# plus compiler scratch, and well inside physical VMEM on v5e/v6e (128 MiB)
# and v7x (64 MiB).  Setting it explicitly removes v5e's 16 MiB default cap.
_VMEM_LIMIT_BYTES = 32 * 1024 * 1024
# Preferred lane-dense slab widths (wide unmasked stores), tried widest first.
_WIDE_COLS = (2048, 1024, 512, 256, 128)


def _relu_kernel(x_ref, o_ref):
    # Pure VPU elementwise on the whole VMEM tile; weak-typed 0 keeps dtype.
    o_ref[...] = jnp.maximum(x_ref[...], 0)


def _tile_target_bytes():
    """Generation-aware tile budget: big enough to amortize the ~0.35us
    per-grid-step overhead, small enough that double-buffered in+out stays
    far under the scoped-VMEM limit on every TPU generation."""
    vmem = 0
    try:
        info = pltpu.get_tpu_info()
        vmem = int(getattr(info, "vmem_capacity_bytes", 0) or 0)
    except Exception:
        vmem = 0
    if vmem <= 0:
        vmem = 64 * 1024 * 1024  # conservative: v7x per-TensorCore VMEM
    budget = min(_VMEM_LIMIT_BYTES, vmem // 2)
    # 4 live tiles (in+out, double-buffered) plus compiler scratch headroom.
    return max(512 * 1024, min(4 * 1024 * 1024, budget // 6))


def _min_sublanes(itemsize):
    # dtype-aware sublane granule: f32 -> 8, bf16 -> 16, int8/fp8 -> 32.
    return max(8, 32 // itemsize)


def _collapse_to_2d(shape):
    """Free contiguous 2D view (R, C): trailing dims merged until C >= 512."""
    c = shape[-1]
    split = len(shape) - 1
    while split > 0 and c < 512:
        split -= 1
        c *= shape[split]
    r = 1
    for d in shape[:split]:
        r *= d
    return int(r), int(c)


def _lane_dense_2d(total):
    """When total % 128 == 0, pick the widest lane-dense (R, C) slab."""
    for c in _WIDE_COLS:
        if total % c == 0:
            return total // c, c
    return None  # unreachable when total % 128 == 0


def _choose_blocks(rows, cols, itemsize):
    min_rows = _min_sublanes(itemsize)
    target_elems = max(min_rows * _LANES, _tile_target_bytes() // itemsize)

    # Columns: keep the full width when it fits the budget with >= min_rows
    # rows; otherwise take a lane-aligned chunk (ragged last block is masked).
    max_full_cols = target_elems // min_rows
    if cols <= max_full_cols:
        tile_cols = cols
    else:
        tile_cols = max(_LANES, (max_full_cols // _LANES) * _LANES)
    col_steps = pl.cdiv(cols, tile_cols)

    # Rows: fill the tile budget but keep >= _MIN_GRID_STEPS total grid steps.
    target_rows = max(min_rows, target_elems // tile_cols)
    want_row_steps = max(1, pl.cdiv(_MIN_GRID_STEPS, col_steps))
    rows_for_steps = pl.cdiv(rows, want_row_steps)
    rows_for_steps = pl.cdiv(rows_for_steps, min_rows) * min_rows
    cand = min(target_rows, rows_for_steps)
    if cand >= rows:
        tile_rows = rows  # full-dim block is always legal
    else:
        tile_rows = min(rows, max(min_rows, (cand // min_rows) * min_rows))
    return int(tile_rows), int(tile_cols)


def _relu_pallas_2d(x2d, *, in_place=False):
    rows, cols = x2d.shape
    itemsize = jnp.dtype(x2d.dtype).itemsize
    tile_rows, tile_cols = _choose_blocks(rows, cols, itemsize)
    grid = (pl.cdiv(rows, tile_rows), pl.cdiv(cols, tile_cols))
    return pl.pallas_call(
        _relu_kernel,
        out_shape=jax.ShapeDtypeStruct((rows, cols), x2d.dtype),
        grid=grid,
        in_specs=[pl.BlockSpec((tile_rows, tile_cols), lambda i, j: (i, j))],
        out_specs=pl.BlockSpec((tile_rows, tile_cols), lambda i, j: (i, j)),
        # In-place only pays off when the caller donates `img` under jit;
        # otherwise XLA inserts a defensive copy, so default is off.
        input_output_aliases=({0: 0} if in_place else {}),
        compiler_params=pltpu.CompilerParams(
            dimension_semantics=("parallel", "parallel"),
            vmem_limit_bytes=_VMEM_LIMIT_BYTES,
        ),
    )(x2d)


def cond_relu(inputs, *, in_place=False):
    """Pallas equivalent of CondReLU.forward.

    inputs: tuple (img, label)
      img:   float array (any shape; NCHW at the wrapper level)
      label: any array, passed through unchanged
    returns (relu(img), label)
    """
    img, label = inputs
    shape = img.shape
    total = 1
    for d in shape:
        total *= d

    # Tiny / empty tensors: skip the custom call entirely.
    if total < _SMALL_INPUT_ELEMS:
        return (jnp.maximum(img, 0), label)

    if total % _LANES == 0:
        # Fully lane-dense slab, wide columns for unmasked stores.
        rows, cols = _lane_dense_2d(total)
    else:
        # Ragged element count: free contiguous 2D view, no pad / no slice;
        # Pallas masks the ragged last block.
        rows, cols = _collapse_to_2d(shape)

    out2d = _relu_pallas_2d(img.reshape(rows, cols), in_place=in_place)
    return (out2d.reshape(shape), label)


if __name__ == "__main__":
    key = jax.random.PRNGKey(0)
    k1, k2, k3, k4 = jax.random.split(key, 4)

    # 1) Spec-sized small input (batch=2, channels=4, spatial=16):
    #    takes the small-input XLA path (same semantics).
    img_small = jax.random.normal(k1, (2, 4, 16, 16), dtype=jnp.float32)
    label = jax.random.randint(k2, (2,), 0, 10, dtype=jnp.int32)
    out_img, out_label = cond_relu((img_small, label))
    jax.block_until_ready(out_img)
    jax.block_until_ready(out_label)
    assert jnp.allclose(out_img, jnp.maximum(img_small, 0.0)), "small ReLU mismatch"
    assert jnp.array_equal(out_label, label), "label passthrough mismatch"

    # 2) Larger input exercising the Pallas kernel (wide lane-dense slab,
    #    >= 4 grid steps).
    img_big = jax.random.normal(k3, (8, 64, 56, 56), dtype=jnp.float32)
    out_big, out_label2 = cond_relu((img_big, label))
    jax.block_until_ready(out_big)
    assert jnp.allclose(out_big, jnp.maximum(img_big, 0.0)), "big ReLU mismatch"
    assert jnp.array_equal(out_label2, label), "label passthrough mismatch (big)"

    # 3) Element count not divisible by 128: exercises the pad-free ragged path
    #    (contiguous 2D view + Pallas-masked last block).
    img_ragged = jax.random.normal(k4, (4, 3, 100, 333), dtype=jnp.float32)
    out_rag, _ = cond_relu((img_ragged, label))
    jax.block_until_ready(out_rag)
    assert jnp.allclose(out_rag, jnp.maximum(img_ragged, 0.0)), "ragged ReLU mismatch"

    print("KERNEL_OK")
</pallas_src>

<mosaic_0001>
module attributes {stable_mosaic.version = 11 : i64} {
  func.func @_relu_kernel(%arg0: i32, %arg1: i32, %arg2: memref<200x2048xf32, #tpu.memory_space<vmem>>, %arg3: memref<200x2048xf32, #tpu.memory_space<vmem>>) attributes {dimension_semantics = [#tpu.dimension_semantics<parallel>, #tpu.dimension_semantics<parallel>], iteration_bounds = array<i64: 4, 1>, scalar_prefetch = 0 : i64, scratch_operands = 0 : i64, tpu.core_type = #tpu.core_type<tc>, window_params = [{transform_indices = @transform_0, window_bounds = array<i64: 200, 2048>}, {transform_indices = @transform_1, window_bounds = array<i64: 200, 2048>}]} {
    %c0 = arith.constant 0 : index
    %c0_0 = arith.constant 0 : index
    %0 = vector.load %arg2[%c0, %c0_0] : memref<200x2048xf32, #tpu.memory_space<vmem>>, vector<200x2048xf32>
    %cst = arith.constant 0.000000e+00 : f32
    %1 = vector.broadcast %cst : f32 to vector<200x2048xf32>
    %2 = arith.maximumf %0, %1 : vector<200x2048xf32>
    %c0_1 = arith.constant 0 : index
    %c0_2 = arith.constant 0 : index
    %3 = vector.load %arg3[%c0_1, %c0_2] : memref<200x2048xf32, #tpu.memory_space<vmem>>, vector<200x2048xf32>
    tpu.vector_store %arg3[%c0_1, %c0_2], %2 {strides = array<i32>} : memref<200x2048xf32, #tpu.memory_space<vmem>>, vector<200x2048xf32>,
    return
  }
  func.func @transform_0(%arg0: i32, %arg1: i32) -> (i32, i32) {
    %c0_i32 = arith.constant 0 : i32
    return %arg0, %arg1 : i32, i32
  }
  func.func @transform_1(%arg0: i32, %arg1: i32) -> (i32, i32) {
    %c0_i32 = arith.constant 0 : i32
    return %arg0, %arg1 : i32, i32
  }
}

</mosaic_0001>

<bundles_post_ra>
// kernel: tpu_custom_call.1
= control target key start
LH: loop header
LB: loop body
LE: loop exit
PB: predicated region body
PF: predicated region fallthrough
CT: control target
= control target key end

     0   :  { %6 = vsyncpa [#allocation3], 0  ;;  %s2687_s0 = inlined_call_operand.hbm [shape: f32[784,2048], index: 0, kind: input, shape index: {}]   ;;  %s2688_s1 = inlined_call_operand.hbm [shape: f32[784,2048], index: 1, kind: output, shape index: {}]  }
   0x1   :  { %8 = vsyncpa [#allocation3 + $0x1], 0 }
   0x2   :  { %9 = vsyncpa [#allocation4], 0 }
   0x3   :  { %11 = vsyncpa [#allocation4 + $0x1], 0  ;;  %s1704_s6 = smov 0   ;;  %s1706_s7 = smov 0  }
   0x4   :  { %s1708_s8 = smov 0   ;;  %s1710_s9 = smov 0  }
   0x5   :  { %s1712_s10 = smov 0   ;;  %s1714_s11 = smov 0  }
   0x6 LB: > { %s1486_s12 = sadd.s32 4294967295, %s1686_s11   ;;  %s1487_s13 = sadd.s32 4294967294, %s1686_s11   ;;  %s1686_s11 = sphi %s1714_s11, %s17_s11   ;;  %s1682_s10 = sphi %s1712_s10, %s2697_s10   ;;  %s1678_s9 = sphi %s1710_s9, %s2696_s9   ;;  %s1674_s8 = sphi %s1708_s8, %s2695_s8   ;;  %s1670_s7 = sphi %s1706_s7, %s2694_s7   ;;  %s1666_s6 = sphi %s1704_s6, %s2693_s6  }
   0x7   : > { %s29_s14 = sadd.s32 1, %s1682_s10  ;;  %s38_s15 = sadd.s32 1, %s1674_s8 }
   0x8   : > { %p31_p0 = scmp.ge.s32.totalorder %s29_s14, 4  ;;  %p45_p1 = scmp.ne.s32.totalorder %s1674_s8, %s1670_s7 }
   0x9   : > { %p46_p2 = scmp.eq.s32.totalorder %s1686_s11, 0  ;;  %p51_p3 = scmp.ne.s32.totalorder %s1670_s7, %s1666_s6 }
   0xa   : > { %s2699_s14 = smov (%p31_p0, %s29_s14), 0  ;;  %p52_p5 = scmp.eq.s32.totalorder %s1486_s12, 0 }
   0xb   : > { %p47_p4 = por %p46_p2, %p45_p1  ;;  %s33_s16 = ssub.s32 %s1682_s10, %s2699_s14 }
   0xc   : > { %p77_p6 = scmp.eq.s32.totalorder %s1486_s12, 3  ;;  %p36_p7 = scmp.eq.s32.totalorder %s33_s16, 0 }
   0xd   : > { %p1747_p8 = por %p52_p5, %p51_p3  ;;  %p83_p10 = scmp.eq.s32.totalorder %s1487_s13, 3 }
   0xe   : > { %p1751_p9 = por %p77_p6, %p45_p1  ;;  %p1489_p12 = scmp.ge.s32.totalorder %s1686_s11, 4 }
   0xf   : > { %s1756_s19 = scalar_select %p36_p7, %s1674_s8, %s38_s15  }
  0x10   : > { %p1758_p11 = por %p83_p10, %p51_p3  ;;  %99 = sbr.rel (%p1489_p12) target bundleno = 58 (0x3a), region = 16 }
  0x12   : > { %s2691_s20 = scalar_select %p1758_p11, 1, 0 }
  0x17   : > { %102 = sbr.rel (!%p47_p4) target bundleno = 58 (0x3a), region = 20  ;;  %s103_s21 = sand.u32 (%p47_p4), 1, %s1674_s8  }
  0x18   : > { %s108_s22 = smul.u32 (%p47_p4), 25, %s1682_s10  ;;  %s1768_s27 = scalar_lea.sflag (%p47_p4), [#allocation3], %s103_s21 }
  0x19   : > { %s1515_s23 = smul.u32 (%p47_p4), 3200, %s103_s21 }
  0x1a   : > { %s110_s24 = ssub.s32 (%p47_p4), 98, %s108_s22 }
  0x1b   : > { %p111_p13 = scmp.lt.s32.totalorder (%p47_p4), %s110_s24, 25  ;;  %s107_s28 = scalar_lea.vmem (%p47_p4), [#allocation2], %s1515_s23 }
  0x1e   : > { %s2701_s24 = smov (!%p111_p13, %s110_s24), 25 }
  0x1f   : > { %s1765_s25 = sshll.u32 %s2701_s24, 11 }
  0x20   : > { %s116_s26 = ssub.s32 51200, %s1765_s25 }
  0x21   : > { %117 = vsyncadd %s1768_s27, %s116_s26  ;;  %p1492_p0 = scmp.ne.s32.totalorder %s1765_s25, 0  ;;  %s1513_s29 = smul.u32 51200, %s1682_s10 }
  0x22   : > { %s124_s30 = sshll.u32 %s107_s28, 4  ;;  %s1580_s15 = scalar_lea.hbm %s2687_s0, 200704  ;;  %s1778_s30 = int_to_ptr.vmem [resolvable:$true] %s124_s30 }
  0x23   : > { %s1776_s4 = scalar_lea.hbm %s2687_s0, %s1513_s29 }
  0x24   : > { %s1576_s5 = scalar_lea.hbm %s1776_s4, %s1765_s25  ;;  %p1581_p4 = scmp.lt.u32.totalorder %s1776_s4, %s2687_s0 }
  0x25   : > { %p1577_p1 = scmp.ne.s32.totalorder %s1776_s4, %s1576_s5  ;;  %p1582_p5 = scmp.lt.u32.totalorder %s1580_s15, %s1576_s5 }
  0x26   : > { %p1584_p7 = scmp.lt.u32.totalorder %s1576_s5, %s1776_s4 }
  0x27   : > { %p1578_p2 = pnand %p1577_p1, %p1492_p0  ;;  %p1583_p6 = por %p1582_p5, %p1581_p4 }
  0x29   : > { %p1579_p3 = pneg %p1578_p2  ;;  %p1585_p10 = por %p1584_p7, %p1583_p6 }
  0x2b   : > { %p1586_p12 = pnand %p1585_p10, %p1579_p3 }
  0x2d   : > { %1589 = shalt.err (!%p1586_p12)
}
  0x2e   : > { %s1590_s22 = scalar_lea.vmem %s1778_s30, %s1765_s25  ;;  %s1688_s23 = smov [#allocation2]  }
  0x2f   : > { %p1591_p13 = scmp.ne.s32.totalorder %s1778_s30, %s1590_s22  ;;  %s1594_s24 = sshll.u32 %s1688_s23, 4  ;;  %s1595_s24 = int_to_ptr.vmem [resolvable:$false] %s1594_s24 }
  0x30   : > { %s1596_s26 = scalar_lea.vmem %s1595_s24, 102400  ;;  %p1597_p11 = scmp.lt.s32.totalorder %s1778_s30, %s1595_s24 }
  0x31   : > { %p1592_p1 = pnand %p1591_p13, %p1492_p0  ;;  %p1598_p4 = scmp.lt.s32.totalorder %s1596_s26, %s1590_s22 }
  0x33   : > { %p1593_p2 = pneg %p1592_p1  ;;  %p1599_p5 = por %p1598_p4, %p1597_p11 }
  0x35   : > { %p1600_p6 = pnand %p1599_p5, %p1593_p2 }
  0x37   : > { %1603 = shalt.err (!%p1600_p6)
}
  0x38   : > { %s1689_s28 = smov 2048   ;;  %s1690_s29 = smov 128  }
  0x39   : > { %130 = dma.hbm_to_vmem [thread:$0]  (%p1492_p0), %s1776_s4, %s1765_s25, %s1778_s30, %s1768_s27, %s1689_s28, %s1689_s28, %s1690_s29  }
  0x3a PF: > { %p1497_p3 = scmp.ge.s32.totalorder %s1686_s11, 1  ;;  %p132_p7 = scmp.lt.s32.totalorder %s1686_s11, 5 }
  0x3c   : > { %p133_p10 = pnand %p1497_p3, %p132_p7 }
  0x3d   : > { %s1808_s2 = sand.u32 (!%p133_p10), 1, %s1670_s7  }
  0x3e   : > { %136 = sbr.rel (%p133_p10) target bundleno = 304 (0x130), region = 24  ;;  %s139_s5 = scalar_lea.sflag (!%p133_p10), [#allocation3], %s1808_s2 }
  0x3f   : > { %s1516_s3 = smul.u32 (!%p133_p10), 3200, %s1808_s2 }
  0x41   : > { %s1812_s12 = scalar_lea.vmem (!%p133_p10), [#allocation2], %s1516_s3 }
  0x45   : > { %1657 = dma.done.wait (%p1747_p8), %s139_s5, 51200  }
  0x46   : > { %1659 = vsyncadd (%p1747_p8), %s139_s5, 4294916096  ;;  %v175_v0 = vld [vmem:[%s1812_s12] sm:$0xff]  ;;  %v176_v1 = vld [vmem:[%s1812_s12 + $0x8] sm:$0xff]  ;;  %s1827_s17 = scalar_lea.vmem [#allocation5], %s1516_s3  ;;  %s1376_s25 = scalar_lea.sflag [#allocation4], %s1808_s2 }
  0x47   : > { %v177_v2 = vld [vmem:[%s1812_s12 + $0x10] sm:$0xff]  ;;  %v575_v3 = vmax.f32 %v175_v0, 0.0  ;;  %v576_v4 = vmax.f32 %v176_v1, 0.0  ;;  %v178_v6 = vld [vmem:[%s1812_s12 + $0x18] sm:$0xff]  ;;  %v179_v7 = vld [vmem:[%s1812_s12 + $0x20] sm:$0xff]  ;;  %s1383_s27 = smul.u32 (%p1751_p9), 25, %s1678_s9 }
  0x48   : > { %v577_v5 = vmax.f32 %v177_v2, 0.0  ;;  %v180_v8 = vld [vmem:[%s1812_s12 + $0x28] sm:$0xff]  ;;  %v578_v9 = vmax.f32 %v178_v6, 0.0  ;;  %v579_v10 = vmax.f32 %v179_v7, 0.0  ;;  %v181_v12 = vld [vmem:[%s1812_s12 + $0x30] sm:$0xff]  ;;  %v182_v13 = vld [vmem:[%s1812_s12 + $0x38] sm:$0xff] }
  0x49   : > { %v580_v11 = vmax.f32 %v180_v8, 0.0  ;;  %v183_v14 = vld [vmem:[%s1812_s12 + $0x40] sm:$0xff]  ;;  %975 = vst [vmem:[%s1827_s17] sm:$0xff] %v575_v3  ;;  %976 = vst [vmem:[%s1827_s17 + $0x8] sm:$0xff] %v576_v4  ;;  %v581_v15 = vmax.f32 %v181_v12, 0.0  ;;  %v582_v16 = vmax.f32 %v182_v13, 0.0  ;;  %v184_v18 = vld [vmem:[%s1812_s12 + $0x48] sm:$0xff] }
  0x4a   : > { %977 = vst [vmem:[%s1827_s17 + $0x10] sm:$0xff] %v577_v5  ;;  %v583_v17 = vmax.f32 %v183_v14, 0.0  ;;  %v185_v19 = vld [vmem:[%s1812_s12 + $0x50] sm:$0xff]  ;;  %v186_v20 = vld [vmem:[%s1812_s12 + $0x58] sm:$0xff]  ;;  %978 = vst [vmem:[%s1827_s17 + $0x18] sm:$0xff] %v578_v9  ;;  %v584_v21 = vmax.f32 %v184_v18, 0.0 }
  0x4b   : > { %979 = vst [vmem:[%s1827_s17 + $0x20] sm:$0xff] %v579_v10  ;;  %980 = vst [vmem:[%s1827_s17 + $0x28] sm:$0xff] %v580_v11  ;;  %v585_v22 = vmax.f32 %v185_v19, 0.0  ;;  %v586_v23 = vmax.f32 %v186_v20, 0.0  ;;  %v187_v24 = vld [vmem:[%s1812_s12 + $0x60] sm:$0xff]  ;;  %v188_v25 = vld [vmem:[%s1812_s12 + $0x68] sm:$0xff] }
  0x4c   : > { %v189_v26 = vld [vmem:[%s1812_s12 + $0x70] sm:$0xff]  ;;  %981 = vst [vmem:[%s1827_s17 + $0x30] sm:$0xff] %v581_v15  ;;  %982 = vst [vmem:[%s1827_s17 + $0x38] sm:$0xff] %v582_v16  ;;  %v587_v27 = vmax.f32 %v187_v24, 0.0  ;;  %v588_v28 = vmax.f32 %v188_v25, 0.0  ;;  %v190_v30 = vld [vmem:[%s1812_s12 + $0x78] sm:$0xff] }
  0x4d   : > { %983 = vst [vmem:[%s1827_s17 + $0x40] sm:$0xff] %v583_v17  ;;  %v589_v29 = vmax.f32 %v189_v26, 0.0  ;;  %v191_v31 = vld [vmem:[%s1812_s12 + $0x80] sm:$0xff]  ;;  %v192_v32 = vld [vmem:[%s1812_s12 + $0x88] sm:$0xff]  ;;  %984 = vst [vmem:[%s1827_s17 + $0x48] sm:$0xff] %v584_v21  ;;  %v590_v33 = vmax.f32 %v190_v30, 0.0 }
  0x4e   : > { %985 = vst [vmem:[%s1827_s17 + $0x50] sm:$0xff] %v585_v22  ;;  %986 = vst [vmem:[%s1827_s17 + $0x58] sm:$0xff] %v586_v23  ;;  %v591_v34 = vmax.f32 %v191_v31, 0.0  ;;  %v592_v35 = vmax.f32 %v192_v32, 0.0  ;;  %v193_v36 = vld [vmem:[%s1812_s12 + $0x90] sm:$0xff]  ;;  %v194_v37 = vld [vmem:[%s1812_s12 + $0x98] sm:$0xff] }
  0x4f   : > { %v195_v38 = vld [vmem:[%s1812_s12 + $0xa0] sm:$0xff]  ;;  %987 = vst [vmem:[%s1827_s17 + $0x60] sm:$0xff] %v587_v27  ;;  %988 = vst [vmem:[%s1827_s17 + $0x68] sm:$0xff] %v588_v28  ;;  %v593_v39 = vmax.f32 %v193_v36, 0.0  ;;  %v594_v40 = vmax.f32 %v194_v37, 0.0  ;;  %v196_v42 = vld [vmem:[%s1812_s12 + $0xa8] sm:$0xff] }
  0x50   : > { %989 = vst [vmem:[%s1827_s17 + $0x70] sm:$0xff] %v589_v29  ;;  %v595_v41 = vmax.f32 %v195_v38, 0.0  ;;  %v197_v43 = vld [vmem:[%s1812_s12 + $0xb0] sm:$0xff]  ;;  %v198_v44 = vld [vmem:[%s1812_s12 + $0xb8] sm:$0xff]  ;;  %990 = vst [vmem:[%s1827_s17 + $0x78] sm:$0xff] %v590_v33  ;;  %v596_v45 = vmax.f32 %v196_v42, 0.0 }
  0x51   : > { %991 = vst [vmem:[%s1827_s17 + $0x80] sm:$0xff] %v591_v34  ;;  %992 = vst [vmem:[%s1827_s17 + $0x88] sm:$0xff] %v592_v35  ;;  %v597_v46 = vmax.f32 %v197_v43, 0.0  ;;  %v598_v47 = vmax.f32 %v198_v44, 0.0  ;;  %v199_v48 = vld [vmem:[%s1812_s12 + $0xc0] sm:$0xff]  ;;  %v200_v49 = vld [vmem:[%s1812_s12 + $0xc8] sm:$0xff] }
  0x52   : > { %v201_v50 = vld [vmem:[%s1812_s12 + $0xd0] sm:$0xff]  ;;  %993 = vst [vmem:[%s1827_s17 + $0x90] sm:$0xff] %v593_v39  ;;  %994 = vst [vmem:[%s1827_s17 + $0x98] sm:$0xff] %v594_v40  ;;  %v599_v51 = vmax.f32 %v199_v48, 0.0  ;;  %v600_v52 = vmax.f32 %v200_v49, 0.0  ;;  %v202_v54 = vld [vmem:[%s1812_s12 + $0xd8] sm:$0xff] }
  0x53   : > { %995 = vst [vmem:[%s1827_s17 + $0xa0] sm:$0xff] %v595_v41  ;;  %v601_v53 = vmax.f32 %v201_v50, 0.0  ;;  %v203_v55 = vld [vmem:[%s1812_s12 + $0xe0] sm:$0xff]  ;;  %v204_v56 = vld [vmem:[%s1812_s12 + $0xe8] sm:$0xff]  ;;  %996 = vst [vmem:[%s1827_s17 + $0xa8] sm:$0xff] %v596_v45  ;;  %v602_v57 = vmax.f32 %v202_v54, 0.0 }
  0x54   : > { %997 = vst [vmem:[%s1827_s17 + $0xb0] sm:$0xff] %v597_v46  ;;  %998 = vst [vmem:[%s1827_s17 + $0xb8] sm:$0xff] %v598_v47  ;;  %v603_v58 = vmax.f32 %v203_v55, 0.0  ;;  %v604_v59 = vmax.f32 %v204_v56, 0.0  ;;  %v205_v60 = vld [vmem:[%s1812_s12 + $0xf0] sm:$0xff]  ;;  %v206_v61 = vld [vmem:[%s1812_s12 + $0xf8] sm:$0xff] }
  0x55   : > { %v207_v62 = vld [vmem:[%s1812_s12 + $0x100] sm:$0xff]  ;;  %999 = vst [vmem:[%s1827_s17 + $0xc0] sm:$0xff] %v599_v51  ;;  %1000 = vst [vmem:[%s1827_s17 + $0xc8] sm:$0xff] %v600_v52  ;;  %v605_v63 = vmax.f32 %v205_v60, 0.0  ;;  %v606_v0 = vmax.f32 %v206_v61, 0.0  ;;  %v208_v2 = vld [vmem:[%s1812_s12 + $0x108] sm:$0xff] }
  0x56   : > { %1001 = vst [vmem:[%s1827_s17 + $0xd0] sm:$0xff] %v601_v53  ;;  %v607_v1 = vmax.f32 %v207_v62, 0.0  ;;  %v209_v3 = vld [vmem:[%s1812_s12 + $0x110] sm:$0xff]  ;;  %v210_v4 = vld [vmem:[%s1812_s12 + $0x118] sm:$0xff]  ;;  %1002 = vst [vmem:[%s1827_s17 + $0xd8] sm:$0xff] %v602_v57  ;;  %v608_v5 = vmax.f32 %v208_v2, 0.0 }
  0x57   : > { %1003 = vst [vmem:[%s1827_s17 + $0xe0] sm:$0xff] %v603_v58  ;;  %1004 = vst [vmem:[%s1827_s17 + $0xe8] sm:$0xff] %v604_v59  ;;  %v609_v6 = vmax.f32 %v209_v3, 0.0  ;;  %v610_v7 = vmax.f32 %v210_v4, 0.0  ;;  %v211_v8 = vld [vmem:[%s1812_s12 + $0x120] sm:$0xff]  ;;  %v212_v9 = vld [vmem:[%s1812_s12 + $0x128] sm:$0xff] }
  0x58   : > { %v213_v10 = vld [vmem:[%s1812_s12 + $0x130] sm:$0xff]  ;;  %1005 = vst [vmem:[%s1827_s17 + $0xf0] sm:$0xff] %v605_v63  ;;  %1006 = vst [vmem:[%s1827_s17 + $0xf8] sm:$0xff] %v606_v0  ;;  %v611_v11 = vmax.f32 %v211_v8, 0.0  ;;  %v612_v12 = vmax.f32 %v212_v9, 0.0  ;;  %v214_v14 = vld [vmem:[%s1812_s12 + $0x138] sm:$0xff] }
  0x59   : > { %1007 = vst [vmem:[%s1827_s17 + $0x100] sm:$0xff] %v607_v1  ;;  %v613_v13 = vmax.f32 %v213_v10, 0.0  ;;  %v215_v15 = vld [vmem:[%s1812_s12 + $0x140] sm:$0xff]  ;;  %v216_v16 = vld [vmem:[%s1812_s12 + $0x148] sm:$0xff]  ;;  %1008 = vst [vmem:[%s1827_s17 + $0x108] sm:$0xff] %v608_v5  ;;  %v614_v17 = vmax.f32 %v214_v14, 0.0 }
  0x5a   : > { %1009 = vst [vmem:[%s1827_s17 + $0x110] sm:$0xff] %v609_v6  ;;  %1010 = vst [vmem:[%s1827_s17 + $0x118] sm:$0xff] %v610_v7  ;;  %v615_v18 = vmax.f32 %v215_v15, 0.0  ;;  %v616_v19 = vmax.f32 %v216_v16, 0.0  ;;  %v217_v20 = vld [vmem:[%s1812_s12 + $0x150] sm:$0xff]  ;;  %v218_v21 = vld [vmem:[%s1812_s12 + $0x158] sm:$0xff] }
  0x5b   : > { %v219_v22 = vld [vmem:[%s1812_s12 + $0x160] sm:$0xff]  ;;  %1011 = vst [vmem:[%s1827_s17 + $0x120] sm:$0xff] %v611_v11  ;;  %1012 = vst [vmem:[%s1827_s17 + $0x128] sm:$0xff] %v612_v12  ;;  %v617_v23 = vmax.f32 %v217_v20, 0.0  ;;  %v618_v24 = vmax.f32 %v218_v21, 0.0  ;;  %v220_v26 = vld [vmem:[%s1812_s12 + $0x168] sm:$0xff] }
  0x5c   : > { %1013 = vst [vmem:[%s1827_s17 + $0x130] sm:$0xff] %v613_v13  ;;  %v619_v25 = vmax.f32 %v219_v22, 0.0  ;;  %v221_v27 = vld [vmem:[%s1812_s12 + $0x170] sm:$0xff]  ;;  %v222_v28 = vld [vmem:[%s1812_s12 + $0x178] sm:$0xff]  ;;  %1014 = vst [vmem:[%s1827_s17 + $0x138] sm:$0xff] %v614_v17  ;;  %v620_v29 = vmax.f32 %v220_v26, 0.0 }
  0x5d   : > { %1015 = vst [vmem:[%s1827_s17 + $0x140] sm:$0xff] %v615_v18  ;;  %1016 = vst [vmem:[%s1827_s17 + $0x148] sm:$0xff] %v616_v19  ;;  %v621_v30 = vmax.f32 %v221_v27, 0.0  ;;  %v622_v31 = vmax.f32 %v222_v28, 0.0  ;;  %v223_v32 = vld [vmem:[%s1812_s12 + $0x180] sm:$0xff]  ;;  %v224_v33 = vld [vmem:[%s1812_s12 + $0x188] sm:$0xff] }
  0x5e   : > { %v225_v34 = vld [vmem:[%s1812_s12 + $0x190] sm:$0xff]  ;;  %1017 = vst [vmem:[%s1827_s17 + $0x150] sm:$0xff] %v617_v23  ;;  %1018 = vst [vmem:[%s1827_s17 + $0x158] sm:$0xff] %v618_v24  ;;  %v623_v35 = vmax.f32 %v223_v32, 0.0  ;;  %v624_v36 = vmax.f32 %v224_v33, 0.0  ;;  %v226_v38 = vld [vmem:[%s1812_s12 + $0x198] sm:$0xff] }
  0x5f   : > { %1019 = vst [vmem:[%s1827_s17 + $0x160] sm:$0xff] %v619_v25  ;;  %v625_v37 = vmax.f32 %v225_v34, 0.0  ;;  %v227_v39 = vld [vmem:[%s1812_s12 + $0x1a0] sm:$0xff]  ;;  %v228_v40 = vld [vmem:[%s1812_s12 + $0x1a8] sm:$0xff]  ;;  %1020 = vst [vmem:[%s1827_s17 + $0x168] sm:$0xff] %v620_v29  ;;  %v626_v41 = vmax.f32 %v226_v38, 0.0 }
  0x60   : > { %1021 = vst [vmem:[%s1827_s17 + $0x170] sm:$0xff] %v621_v30  ;;  %1022 = vst [vmem:[%s1827_s17 + $0x178] sm:$0xff] %v622_v31  ;;  %v627_v42 = vmax.f32 %v227_v39, 0.0  ;;  %v628_v43 = vmax.f32 %v228_v40, 0.0  ;;  %v229_v44 = vld [vmem:[%s1812_s12 + $0x1b0] sm:$0xff]  ;;  %v230_v45 = vld [vmem:[%s1812_s12 + $0x1b8] sm:$0xff] }
  0x61   : > { %v231_v46 = vld [vmem:[%s1812_s12 + $0x1c0] sm:$0xff]  ;;  %1023 = vst [vmem:[%s1827_s17 + $0x180] sm:$0xff] %v623_v35  ;;  %1024 = vst [vmem:[%s1827_s17 + $0x188] sm:$0xff] %v624_v36  ;;  %v629_v47 = vmax.f32 %v229_v44, 0.0  ;;  %v630_v48 = vmax.f32 %v230_v45, 0.0  ;;  %v232_v50 = vld [vmem:[%s1812_s12 + $0x1c8] sm:$0xff] }
  0x62   : > { %1025 = vst [vmem:[%s1827_s17 + $0x190] sm:$0xff] %v625_v37  ;;  %v631_v49 = vmax.f32 %v231_v46, 0.0  ;;  %v233_v51 = vld [vmem:[%s1812_s12 + $0x1d0] sm:$0xff]  ;;  %v234_v52 = vld [vmem:[%s1812_s12 + $0x1d8] sm:$0xff]  ;;  %1026 = vst [vmem:[%s1827_s17 + $0x198] sm:$0xff] %v626_v41  ;;  %v632_v53 = vmax.f32 %v232_v50, 0.0 }
  0x63   : > { %1027 = vst [vmem:[%s1827_s17 + $0x1a0] sm:$0xff] %v627_v42  ;;  %1028 = vst [vmem:[%s1827_s17 + $0x1a8] sm:$0xff] %v628_v43  ;;  %v633_v54 = vmax.f32 %v233_v51, 0.0  ;;  %v634_v55 = vmax.f32 %v234_v52, 0.0  ;;  %v235_v56 = vld [vmem:[%s1812_s12 + $0x1e0] sm:$0xff]  ;;  %v236_v57 = vld [vmem:[%s1812_s12 + $0x1e8] sm:$0xff] }
  0x64   : > { %v237_v58 = vld [vmem:[%s1812_s12 + $0x1f0] sm:$0xff]  ;;  %1029 = vst [vmem:[%s1827_s17 + $0x1b0] sm:$0xff] %v629_v47  ;;  %1030 = vst [vmem:[%s1827_s17 + $0x1b8] sm:$0xff] %v630_v48  ;;  %v635_v59 = vmax.f32 %v235_v56, 0.0  ;;  %v636_v60 = vmax.f32 %v236_v57, 0.0  ;;  %v238_v62 = vld [vmem:[%s1812_s12 + $0x1f8] sm:$0xff] }
  0x65   : > { %1031 = vst [vmem:[%s1827_s17 + $0x1c0] sm:$0xff] %v631_v49  ;;  %v637_v61 = vmax.f32 %v237_v58, 0.0  ;;  %v239_v63 = vld [vmem:[%s1812_s12 + $0x200] sm:$0xff]  ;;  %v240_v0 = vld [vmem:[%s1812_s12 + $0x208] sm:$0xff]  ;;  %1032 = vst [vmem:[%s1827_s17 + $0x1c8] sm:$0xff] %v632_v53  ;;  %v638_v1 = vmax.f32 %v238_v62, 0.0 }
  0x66   : > { %1033 = vst [vmem:[%s1827_s17 + $0x1d0] sm:$0xff] %v633_v54  ;;  %1034 = vst [vmem:[%s1827_s17 + $0x1d8] sm:$0xff] %v634_v55  ;;  %v639_v2 = vmax.f32 %v239_v63, 0.0  ;;  %v640_v3 = vmax.f32 %v240_v0, 0.0  ;;  %v241_v4 = vld [vmem:[%s1812_s12 + $0x210] sm:$0xff]  ;;  %v242_v5 = vld [vmem:[%s1812_s12 + $0x218] sm:$0xff] }
  0x67   : > { %v243_v6 = vld [vmem:[%s1812_s12 + $0x220] sm:$0xff]  ;;  %1035 = vst [vmem:[%s1827_s17 + $0x1e0] sm:$0xff] %v635_v59  ;;  %1036 = vst [vmem:[%s1827_s17 + $0x1e8] sm:$0xff] %v636_v60  ;;  %v641_v7 = vmax.f32 %v241_v4, 0.0  ;;  %v642_v8 = vmax.f32 %v242_v5, 0.0  ;;  %v244_v10 = vld [vmem:[%s1812_s12 + $0x228] sm:$0xff] }
  0x68   : > { %1037 = vst [vmem:[%s1827_s17 + $0x1f0] sm:$0xff] %v637_v61  ;;  %v643_v9 = vmax.f32 %v243_v6, 0.0  ;;  %v245_v11 = vld [vmem:[%s1812_s12 + $0x230] sm:$0xff]  ;;  %v246_v12 = vld [vmem:[%s1812_s12 + $0x238] sm:$0xff]  ;;  %1038 = vst [vmem:[%s1827_s17 + $0x1f8] sm:$0xff] %v638_v1  ;;  %v644_v13 = vmax.f32 %v244_v10, 0.0 }
  0x69   : > { %1039 = vst [vmem:[%s1827_s17 + $0x200] sm:$0xff] %v639_v2  ;;  %1040 = vst [vmem:[%s1827_s17 + $0x208] sm:$0xff] %v640_v3  ;;  %v645_v14 = vmax.f32 %v245_v11, 0.0  ;;  %v646_v15 = vmax.f32 %v246_v12, 0.0  ;;  %v247_v16 = vld [vmem:[%s1812_s12 + $0x240] sm:$0xff]  ;;  %v248_v17 = vld [vmem:[%s1812_s12 + $0x248] sm:$0xff] }
  0x6a   : > { %v249_v18 = vld [vmem:[%s1812_s12 + $0x250] sm:$0xff]  ;;  %1041 = vst [vmem:[%s1827_s17 + $0x210] sm:$0xff] %v641_v7  ;;  %1042 = vst [vmem:[%s1827_s17 + $0x218] sm:$0xff] %v642_v8  ;;  %v647_v19 = vmax.f32 %v247_v16, 0.0  ;;  %v648_v20 = vmax.f32 %v248_v17, 0.0  ;;  %v250_v22 = vld [vmem:[%s1812_s12 + $0x258] sm:$0xff] }
  0x6b   : > { %1043 = vst [vmem:[%s1827_s17 + $0x220] sm:$0xff] %v643_v9  ;;  %v649_v21 = vmax.f32 %v249_v18, 0.0  ;;  %v251_v23 = vld [vmem:[%s1812_s12 + $0x260] sm:$0xff]  ;;  %v252_v24 = vld [vmem:[%s1812_s12 + $0x268] sm:$0xff]  ;;  %1044 = vst [vmem:[%s1827_s17 + $0x228] sm:$0xff] %v644_v13  ;;  %v650_v25 = vmax.f32 %v250_v22, 0.0 }
  0x6c   : > { %1045 = vst [vmem:[%s1827_s17 + $0x230] sm:$0xff] %v645_v14  ;;  %1046 = vst [vmem:[%s1827_s17 + $0x238] sm:$0xff] %v646_v15  ;;  %v651_v26 = vmax.f32 %v251_v23, 0.0  ;;  %v652_v27 = vmax.f32 %v252_v24, 0.0  ;;  %v253_v28 = vld [vmem:[%s1812_s12 + $0x270] sm:$0xff]  ;;  %v254_v29 = vld [vmem:[%s1812_s12 + $0x278] sm:$0xff] }
  0x6d   : > { %v255_v30 = vld [vmem:[%s1812_s12 + $0x280] sm:$0xff]  ;;  %1047 = vst [vmem:[%s1827_s17 + $0x240] sm:$0xff] %v647_v19  ;;  %1048 = vst [vmem:[%s1827_s17 + $0x248] sm:$0xff] %v648_v20  ;;  %v653_v31 = vmax.f32 %v253_v28, 0.0  ;;  %v654_v32 = vmax.f32 %v254_v29, 0.0  ;;  %v256_v34 = vld [vmem:[%s1812_s12 + $0x288] sm:$0xff] }
  0x6e   : > { %1049 = vst [vmem:[%s1827_s17 + $0x250] sm:$0xff] %v649_v21  ;;  %v655_v33 = vmax.f32 %v255_v30, 0.0  ;;  %v257_v35 = vld [vmem:[%s1812_s12 + $0x290] sm:$0xff]  ;;  %v258_v36 = vld [vmem:[%s1812_s12 + $0x298] sm:$0xff]  ;;  %1050 = vst [vmem:[%s1827_s17 + $0x258] sm:$0xff] %v650_v25  ;;  %v656_v37 = vmax.f32 %v256_v34, 0.0 }
  0x6f   : > { %1051 = vst [vmem:[%s1827_s17 + $0x260] sm:$0xff] %v651_v26  ;;  %1052 = vst [vmem:[%s1827_s17 + $0x268] sm:$0xff] %v652_v27  ;;  %v657_v38 = vmax.f32 %v257_v35, 0.0  ;;  %v658_v39 = vmax.f32 %v258_v36, 0.0  ;;  %v259_v40 = vld [vmem:[%s1812_s12 + $0x2a0] sm:$0xff]  ;;  %v260_v41 = vld [vmem:[%s1812_s12 + $0x2a8] sm:$0xff] }
  0x70   : > { %v261_v42 = vld [vmem:[%s1812_s12 + $0x2b0] sm:$0xff]  ;;  %1053 = vst [vmem:[%s1827_s17 + $0x270] sm:$0xff] %v653_v31  ;;  %1054 = vst [vmem:[%s1827_s17 + $0x278] sm:$0xff] %v654_v32  ;;  %v659_v43 = vmax.f32 %v259_v40, 0.0  ;;  %v660_v44 = vmax.f32 %v260_v41, 0.0  ;;  %v262_v46 = vld [vmem:[%s1812_s12 + $0x2b8] sm:$0xff] }
  0x71   : > { %1055 = vst [vmem:[%s1827_s17 + $0x280] sm:$0xff] %v655_v33  ;;  %v661_v45 = vmax.f32 %v261_v42, 0.0  ;;  %v263_v47 = vld [vmem:[%s1812_s12 + $0x2c0] sm:$0xff]  ;;  %v264_v48 = vld [vmem:[%s1812_s12 + $0x2c8] sm:$0xff]  ;;  %1056 = vst [vmem:[%s1827_s17 + $0x288] sm:$0xff] %v656_v37  ;;  %v662_v49 = vmax.f32 %v262_v46, 0.0 }
  0x72   : > { %1057 = vst [vmem:[%s1827_s17 + $0x290] sm:$0xff] %v657_v38  ;;  %1058 = vst [vmem:[%s1827_s17 + $0x298] sm:$0xff] %v658_v39  ;;  %v663_v50 = vmax.f32 %v263_v47, 0.0  ;;  %v664_v51 = vmax.f32 %v264_v48, 0.0  ;;  %v265_v52 = vld [vmem:[%s1812_s12 + $0x2d0] sm:$0xff]  ;;  %v266_v53 = vld [vmem:[%s1812_s12 + $0x2d8] sm:$0xff] }
  0x73   : > { %v267_v54 = vld [vmem:[%s1812_s12 + $0x2e0] sm:$0xff]  ;;  %1059 = vst [vmem:[%s1827_s17 + $0x2a0] sm:$0xff] %v659_v43  ;;  %1060 = vst [vmem:[%s1827_s17 + $0x2a8] sm:$0xff] %v660_v44  ;;  %v665_v55 = vmax.f32 %v265_v52, 0.0  ;;  %v666_v56 = vmax.f32 %v266_v53, 0.0  ;;  %v268_v58 = vld [vmem:[%s1812_s12 + $0x2e8] sm:$0xff] }
  0x74   : > { %1061 = vst [vmem:[%s1827_s17 + $0x2b0] sm:$0xff] %v661_v45  ;;  %v667_v57 = vmax.f32 %v267_v54, 0.0  ;;  %v269_v59 = vld [vmem:[%s1812_s12 + $0x2f0] sm:$0xff]  ;;  %v270_v60 = vld [vmem:[%s1812_s12 + $0x2f8] sm:$0xff]  ;;  %1062 = vst [vmem:[%s1827_s17 + $0x2b8] sm:$0xff] %v662_v49  ;;  %v668_v61 = vmax.f32 %v268_v58, 0.0 }
  0x75   : > { %1063 = vst [vmem:[%s1827_s17 + $0x2c0] sm:$0xff] %v663_v50  ;;  %1064 = vst [vmem:[%s1827_s17 + $0x2c8] sm:$0xff] %v664_v51  ;;  %v669_v62 = vmax.f32 %v269_v59, 0.0  ;;  %v670_v63 = vmax.f32 %v270_v60, 0.0  ;;  %v271_v0 = vld [vmem:[%s1812_s12 + $0x300] sm:$0xff]  ;;  %v272_v1 = vld [vmem:[%s1812_s12 + $0x308] sm:$0xff] }
  0x76   : > { %v273_v2 = vld [vmem:[%s1812_s12 + $0x310] sm:$0xff]  ;;  %1065 = vst [vmem:[%s1827_s17 + $0x2d0] sm:$0xff] %v665_v55  ;;  %1066 = vst [vmem:[%s1827_s17 + $0x2d8] sm:$0xff] %v666_v56  ;;  %v671_v3 = vmax.f32 %v271_v0, 0.0  ;;  %v672_v4 = vmax.f32 %v272_v1, 0.0  ;;  %v274_v6 = vld [vmem:[%s1812_s12 + $0x318] sm:$0xff] }
  0x77   : > { %1067 = vst [vmem:[%s1827_s17 + $0x2e0] sm:$0xff] %v667_v57  ;;  %v673_v5 = vmax.f32 %v273_v2, 0.0  ;;  %v275_v7 = vld [vmem:[%s1812_s12 + $0x320] sm:$0xff]  ;;  %v276_v8 = vld [vmem:[%s1812_s12 + $0x328] sm:$0xff]  ;;  %1068 = vst [vmem:[%s1827_s17 + $0x2e8] sm:$0xff] %v668_v61  ;;  %v674_v9 = vmax.f32 %v274_v6, 0.0 }
  0x78   : > { %1069 = vst [vmem:[%s1827_s17 + $0x2f0] sm:$0xff] %v669_v62  ;;  %1070 = vst [vmem:[%s1827_s17 + $0x2f8] sm:$0xff] %v670_v63  ;;  %v675_v10 = vmax.f32 %v275_v7, 0.0  ;;  %v676_v11 = vmax.f32 %v276_v8, 0.0  ;;  %v277_v12 = vld [vmem:[%s1812_s12 + $0x330] sm:$0xff]  ;;  %v278_v13 = vld [vmem:[%s1812_s12 + $0x338] sm:$0xff] }
  0x79   : > { %v279_v14 = vld [vmem:[%s1812_s12 + $0x340] sm:$0xff]  ;;  %1071 = vst [vmem:[%s1827_s17 + $0x300] sm:$0xff] %v671_v3  ;;  %1072 = vst [vmem:[%s1827_s17 + $0x308] sm:$0xff] %v672_v4  ;;  %v677_v15 = vmax.f32 %v277_v12, 0.0  ;;  %v678_v16 = vmax.f32 %v278_v13, 0.0  ;;  %v280_v18 = vld [vmem:[%s1812_s12 + $0x348] sm:$0xff] }
  0x7a   : > { %1073 = vst [vmem:[%s1827_s17 + $0x310] sm:$0xff] %v673_v5  ;;  %v679_v17 = vmax.f32 %v279_v14, 0.0  ;;  %v281_v19 = vld [vmem:[%s1812_s12 + $0x350] sm:$0xff]  ;;  %v282_v20 = vld [vmem:[%s1812_s12 + $0x358] sm:$0xff]  ;;  %1074 = vst [vmem:[%s1827_s17 + $0x318] sm:$0xff] %v674_v9  ;;  %v680_v21 = vmax.f32 %v280_v18, 0.0 }
  0x7b   : > { %1075 = vst [vmem:[%s1827_s17 + $0x320] sm:$0xff] %v675_v10  ;;  %1076 = vst [vmem:[%s1827_s17 + $0x328] sm:$0xff] %v676_v11  ;;  %v681_v22 = vmax.f32 %v281_v19, 0.0  ;;  %v682_v23 = vmax.f32 %v282_v20, 0.0  ;;  %v283_v24 = vld [vmem:[%s1812_s12 + $0x360] sm:$0xff]  ;;  %v284_v25 = vld [vmem:[%s1812_s12 + $0x368] sm:$0xff] }
  0x7c   : > { %v285_v26 = vld [vmem:[%s1812_s12 + $0x370] sm:$0xff]  ;;  %1077 = vst [vmem:[%s1827_s17 + $0x330] sm:$0xff] %v677_v15  ;;  %1078 = vst [vmem:[%s1827_s17 + $0x338] sm:$0xff] %v678_v16  ;;  %v683_v27 = vmax.f32 %v283_v24, 0.0  ;;  %v684_v28 = vmax.f32 %v284_v25, 0.0  ;;  %v286_v30 = vld [vmem:[%s1812_s12 + $0x378] sm:$0xff] }
  0x7d   : > { %1079 = vst [vmem:[%s1827_s17 + $0x340] sm:$0xff] %v679_v17  ;;  %v685_v29 = vmax.f32 %v285_v26, 0.0  ;;  %v287_v31 = vld [vmem:[%s1812_s12 + $0x380] sm:$0xff]  ;;  %v288_v32 = vld [vmem:[%s1812_s12 + $0x388] sm:$0xff]  ;;  %1080 = vst [vmem:[%s1827_s17 + $0x348] sm:$0xff] %v680_v21  ;;  %v686_v33 = vmax.f32 %v286_v30, 0.0 }
  0x7e   : > { %1081 = vst [vmem:[%s1827_s17 + $0x350] sm:$0xff] %v681_v22  ;;  %1082 = vst [vmem:[%s1827_s17 + $0x358] sm:$0xff] %v682_v23  ;;  %v687_v34 = vmax.f32 %v287_v31, 0.0  ;;  %v688_v35 = vmax.f32 %v288_v32, 0.0  ;;  %v289_v36 = vld [vmem:[%s1812_s12 + $0x390] sm:$0xff]  ;;  %v290_v37 = vld [vmem:[%s1812_s12 + $0x398] sm:$0xff] }
  0x7f   : > { %v291_v38 = vld [vmem:[%s1812_s12 + $0x3a0] sm:$0xff]  ;;  %1083 = vst [vmem:[%s1827_s17 + $0x360] sm:$0xff] %v683_v27  ;;  %1084 = vst [vmem:[%s1827_s17 + $0x368] sm:$0xff] %v684_v28  ;;  %v689_v39 = vmax.f32 %v289_v36, 0.0  ;;  %v690_v40 = vmax.f32 %v290_v37, 0.0  ;;  %v292_v42 = vld [vmem:[%s1812_s12 + $0x3a8] sm:$0xff] }
  0x80   : > { %1085 = vst [vmem:[%s1827_s17 + $0x370] sm:$0xff] %v685_v29  ;;  %v691_v41 = vmax.f32 %v291_v38, 0.0  ;;  %v293_v43 = vld [vmem:[%s1812_s12 + $0x3b0] sm:$0xff]  ;;  %v294_v44 = vld [vmem:[%s1812_s12 + $0x3b8] sm:$0xff]  ;;  %1086 = vst [vmem:[%s1827_s17 + $0x378] sm:$0xff] %v686_v33  ;;  %v692_v45 = vmax.f32 %v292_v42, 0.0 }
  0x81   : > { %1087 = vst [vmem:[%s1827_s17 + $0x380] sm:$0xff] %v687_v34  ;;  %1088 = vst [vmem:[%s1827_s17 + $0x388] sm:$0xff] %v688_v35  ;;  %v693_v46 = vmax.f32 %v293_v43, 0.0  ;;  %v694_v47 = vmax.f32 %v294_v44, 0.0  ;;  %v295_v48 = vld [vmem:[%s1812_s12 + $0x3c0] sm:$0xff]  ;;  %v296_v49 = vld [vmem:[%s1812_s12 + $0x3c8] sm:$0xff] }
  0x82   : > { %v297_v50 = vld [vmem:[%s1812_s12 + $0x3d0] sm:$0xff]  ;;  %1089 = vst [vmem:[%s1827_s17 + $0x390] sm:$0xff] %v689_v39  ;;  %1090 = vst [vmem:[%s1827_s17 + $0x398] sm:$0xff] %v690_v40  ;;  %v695_v51 = vmax.f32 %v295_v48, 0.0  ;;  %v696_v52 = vmax.f32 %v296_v49, 0.0  ;;  %v298_v54 = vld [vmem:[%s1812_s12 + $0x3d8] sm:$0xff] }
  0x83   : > { %1091 = vst [vmem:[%s1827_s17 + $0x3a0] sm:$0xff] %v691_v41  ;;  %v697_v53 = vmax.f32 %v297_v50, 0.0  ;;  %v299_v55 = vld [vmem:[%s1812_s12 + $0x3e0] sm:$0xff]  ;;  %v300_v56 = vld [vmem:[%s1812_s12 + $0x3e8] sm:$0xff]  ;;  %1092 = vst [vmem:[%s1827_s17 + $0x3a8] sm:$0xff] %v692_v45  ;;  %v698_v57 = vmax.f32 %v298_v54, 0.0 }
  0x84   : > { %1093 = vst [vmem:[%s1827_s17 + $0x3b0] sm:$0xff] %v693_v46  ;;  %1094 = vst [vmem:[%s1827_s17 + $0x3b8] sm:$0xff] %v694_v47  ;;  %v699_v58 = vmax.f32 %v299_v55, 0.0  ;;  %v700_v59 = vmax.f32 %v300_v56, 0.0  ;;  %v301_v60 = vld [vmem:[%s1812_s12 + $0x3f0] sm:$0xff]  ;;  %v302_v61 = vld [vmem:[%s1812_s12 + $0x3f8] sm:$0xff] }
  0x85   : > { %v303_v62 = vld [vmem:[%s1812_s12 + $0x400] sm:$0xff]  ;;  %1095 = vst [vmem:[%s1827_s17 + $0x3c0] sm:$0xff] %v695_v51  ;;  %1096 = vst [vmem:[%s1827_s17 + $0x3c8] sm:$0xff] %v696_v52  ;;  %v701_v63 = vmax.f32 %v301_v60, 0.0  ;;  %v702_v0 = vmax.f32 %v302_v61, 0.0  ;;  %v304_v2 = vld [vmem:[%s1812_s12 + $0x408] sm:$0xff] }
  0x86   : > { %1097 = vst [vmem:[%s1827_s17 + $0x3d0] sm:$0xff] %v697_v53  ;;  %v703_v1 = vmax.f32 %v303_v62, 0.0  ;;  %v305_v3 = vld [vmem:[%s1812_s12 + $0x410] sm:$0xff]  ;;  %v306_v4 = vld [vmem:[%s1812_s12 + $0x418] sm:$0xff]  ;;  %1098 = vst [vmem:[%s1827_s17 + $0x3d8] sm:$0xff] %v698_v57  ;;  %v704_v5 = vmax.f32 %v304_v2, 0.0 }
  0x87   : > { %1099 = vst [vmem:[%s1827_s17 + $0x3e0] sm:$0xff] %v699_v58  ;;  %1100 = vst [vmem:[%s1827_s17 + $0x3e8] sm:$0xff] %v700_v59  ;;  %v705_v6 = vmax.f32 %v305_v3, 0.0  ;;  %v706_v7 = vmax.f32 %v306_v4, 0.0  ;;  %v307_v8 = vld [vmem:[%s1812_s12 + $0x420] sm:$0xff]  ;;  %v308_v9 = vld [vmem:[%s1812_s12 + $0x428] sm:$0xff] }
  0x88   : > { %v309_v10 = vld [vmem:[%s1812_s12 + $0x430] sm:$0xff]  ;;  %1101 = vst [vmem:[%s1827_s17 + $0x3f0] sm:$0xff] %v701_v63  ;;  %1102 = vst [vmem:[%s1827_s17 + $0x3f8] sm:$0xff] %v702_v0  ;;  %v707_v11 = vmax.f32 %v307_v8, 0.0  ;;  %v708_v12 = vmax.f32 %v308_v9, 0.0  ;;  %v310_v14 = vld [vmem:[%s1812_s12 + $0x438] sm:$0xff] }
  0x89   : > { %1103 = vst [vmem:[%s1827_s17 + $0x400] sm:$0xff] %v703_v1  ;;  %v709_v13 = vmax.f32 %v309_v10, 0.0  ;;  %v311_v15 = vld [vmem:[%s1812_s12 + $0x440] sm:$0xff]  ;;  %v312_v16 = vld [vmem:[%s1812_s12 + $0x448] sm:$0xff]  ;;  %1104 = vst [vmem:[%s1827_s17 + $0x408] sm:$0xff] %v704_v5  ;;  %v710_v17 = vmax.f32 %v310_v14, 0.0 }
  0x8a   : > { %1105 = vst [vmem:[%s1827_s17 + $0x410] sm:$0xff] %v705_v6  ;;  %1106 = vst [vmem:[%s1827_s17 + $0x418] sm:$0xff] %v706_v7  ;;  %v711_v18 = vmax.f32 %v311_v15, 0.0  ;;  %v712_v19 = vmax.f32 %v312_v16, 0.0  ;;  %v313_v20 = vld [vmem:[%s1812_s12 + $0x450] sm:$0xff]  ;;  %v314_v21 = vld [vmem:[%s1812_s12 + $0x458] sm:$0xff] }
  0x8b   : > { %v315_v22 = vld [vmem:[%s1812_s12 + $0x460] sm:$0xff]  ;;  %1107 = vst [vmem:[%s1827_s17 + $0x420] sm:$0xff] %v707_v11  ;;  %1108 = vst [vmem:[%s1827_s17 + $0x428] sm:$0xff] %v708_v12  ;;  %v713_v23 = vmax.f32 %v313_v20, 0.0  ;;  %v714_v24 = vmax.f32 %v314_v21, 0.0  ;;  %v316_v26 = vld [vmem:[%s1812_s12 + $0x468] sm:$0xff] }
  0x8c   : > { %1109 = vst [vmem:[%s1827_s17 + $0x430] sm:$0xff] %v709_v13  ;;  %v715_v25 = vmax.f32 %v315_v22, 0.0  ;;  %v317_v27 = vld [vmem:[%s1812_s12 + $0x470] sm:$0xff]  ;;  %v318_v28 = vld [vmem:[%s1812_s12 + $0x478] sm:$0xff]  ;;  %1110 = vst [vmem:[%s1827_s17 + $0x438] sm:$0xff] %v710_v17  ;;  %v716_v29 = vmax.f32 %v316_v26, 0.0 }
  0x8d   : > { %1111 = vst [vmem:[%s1827_s17 + $0x440] sm:$0xff] %v711_v18  ;;  %1112 = vst [vmem:[%s1827_s17 + $0x448] sm:$0xff] %v712_v19  ;;  %v717_v30 = vmax.f32 %v317_v27, 0.0  ;;  %v718_v31 = vmax.f32 %v318_v28, 0.0  ;;  %v319_v32 = vld [vmem:[%s1812_s12 + $0x480] sm:$0xff]  ;;  %v320_v33 = vld [vmem:[%s1812_s12 + $0x488] sm:$0xff] }
  0x8e   : > { %v321_v34 = vld [vmem:[%s1812_s12 + $0x490] sm:$0xff]  ;;  %1113 = vst [vmem:[%s1827_s17 + $0x450] sm:$0xff] %v713_v23  ;;  %1114 = vst [vmem:[%s1827_s17 + $0x458] sm:$0xff] %v714_v24  ;;  %v719_v35 = vmax.f32 %v319_v32, 0.0  ;;  %v720_v36 = vmax.f32 %v320_v33, 0.0  ;;  %v322_v38 = vld [vmem:[%s1812_s12 + $0x498] sm:$0xff] }
  0x8f   : > { %1115 = vst [vmem:[%s1827_s17 + $0x460] sm:$0xff] %v715_v25  ;;  %v721_v37 = vmax.f32 %v321_v34, 0.0  ;;  %v323_v39 = vld [vmem:[%s1812_s12 + $0x4a0] sm:$0xff]  ;;  %v324_v40 = vld [vmem:[%s1812_s12 + $0x4a8] sm:$0xff]  ;;  %1116 = vst [vmem:[%s1827_s17 + $0x468] sm:$0xff] %v716_v29  ;;  %v722_v41 = vmax.f32 %v322_v38, 0.0 }
  0x90   : > { %1117 = vst [vmem:[%s1827_s17 + $0x470] sm:$0xff] %v717_v30  ;;  %1118 = vst [vmem:[%s1827_s17 + $0x478] sm:$0xff] %v718_v31  ;;  %v723_v42 = vmax.f32 %v323_v39, 0.0  ;;  %v724_v43 = vmax.f32 %v324_v40, 0.0  ;;  %v325_v44 = vld [vmem:[%s1812_s12 + $0x4b0] sm:$0xff]  ;;  %v326_v45 = vld [vmem:[%s1812_s12 + $0x4b8] sm:$0xff] }
  0x91   : > { %v327_v46 = vld [vmem:[%s1812_s12 + $0x4c0] sm:$0xff]  ;;  %1119 = vst [vmem:[%s1827_s17 + $0x480] sm:$0xff] %v719_v35  ;;  %1120 = vst [vmem:[%s1827_s17 + $0x488] sm:$0xff] %v720_v36  ;;  %v725_v47 = vmax.f32 %v325_v44, 0.0  ;;  %v726_v48 = vmax.f32 %v326_v45, 0.0  ;;  %v328_v50 = vld [vmem:[%s1812_s12 + $0x4c8] sm:$0xff] }
  0x92   : > { %1121 = vst [vmem:[%s1827_s17 + $0x490] sm:$0xff] %v721_v37  ;;  %v727_v49 = vmax.f32 %v327_v46, 0.0  ;;  %v329_v51 = vld [vmem:[%s1812_s12 + $0x4d0] sm:$0xff]  ;;  %v330_v52 = vld [vmem:[%s1812_s12 + $0x4d8] sm:$0xff]  ;;  %1122 = vst [vmem:[%s1827_s17 + $0x498] sm:$0xff] %v722_v41  ;;  %v728_v53 = vmax.f32 %v328_v50, 0.0 }
  0x93   : > { %1123 = vst [vmem:[%s1827_s17 + $0x4a0] sm:$0xff] %v723_v42  ;;  %1124 = vst [vmem:[%s1827_s17 + $0x4a8] sm:$0xff] %v724_v43  ;;  %v729_v54 = vmax.f32 %v329_v51, 0.0  ;;  %v730_v55 = vmax.f32 %v330_v52, 0.0  ;;  %v331_v56 = vld [vmem:[%s1812_s12 + $0x4e0] sm:$0xff]  ;;  %v332_v57 = vld [vmem:[%s1812_s12 + $0x4e8] sm:$0xff] }
  0x94   : > { %v333_v58 = vld [vmem:[%s1812_s12 + $0x4f0] sm:$0xff]  ;;  %1125 = vst [vmem:[%s1827_s17 + $0x4b0] sm:$0xff] %v725_v47  ;;  %1126 = vst [vmem:[%s1827_s17 + $0x4b8] sm:$0xff] %v726_v48  ;;  %v731_v59 = vmax.f32 %v331_v56, 0.0  ;;  %v732_v60 = vmax.f32 %v332_v57, 0.0  ;;  %v334_v62 = vld [vmem:[%s1812_s12 + $0x4f8] sm:$0xff] }
  0x95   : > { %1127 = vst [vmem:[%s1827_s17 + $0x4c0] sm:$0xff] %v727_v49  ;;  %v733_v61 = vmax.f32 %v333_v58, 0.0  ;;  %v335_v63 = vld [vmem:[%s1812_s12 + $0x500] sm:$0xff]  ;;  %v336_v0 = vld [vmem:[%s1812_s12 + $0x508] sm:$0xff]  ;;  %1128 = vst [vmem:[%s1827_s17 + $0x4c8] sm:$0xff] %v728_v53  ;;  %v734_v1 = vmax.f32 %v334_v62, 0.0 }
  0x96   : > { %1129 = vst [vmem:[%s1827_s17 + $0x4d0] sm:$0xff] %v729_v54  ;;  %1130 = vst [vmem:[%s1827_s17 + $0x4d8] sm:$0xff] %v730_v55  ;;  %v735_v2 = vmax.f32 %v335_v63, 0.0  ;;  %v736_v3 = vmax.f32 %v336_v0, 0.0  ;;  %v337_v4 = vld [vmem:[%s1812_s12 + $0x510] sm:$0xff]  ;;  %v338_v5 = vld [vmem:[%s1812_s12 + $0x518] sm:$0xff] }
  0x97   : > { %v339_v6 = vld [vmem:[%s1812_s12 + $0x520] sm:$0xff]  ;;  %1131 = vst [vmem:[%s1827_s17 + $0x4e0] sm:$0xff] %v731_v59  ;;  %1132 = vst [vmem:[%s1827_s17 + $0x4e8] sm:$0xff] %v732_v60  ;;  %v737_v7 = vmax.f32 %v337_v4, 0.0  ;;  %v738_v8 = vmax.f32 %v338_v5, 0.0  ;;  %v340_v10 = vld [vmem:[%s1812_s12 + $0x528] sm:$0xff] }
  0x98   : > { %1133 = vst [vmem:[%s1827_s17 + $0x4f0] sm:$0xff] %v733_v61  ;;  %v739_v9 = vmax.f32 %v339_v6, 0.0  ;;  %v341_v11 = vld [vmem:[%s1812_s12 + $0x530] sm:$0xff]  ;;  %v342_v12 = vld [vmem:[%s1812_s12 + $0x538] sm:$0xff]  ;;  %1134 = vst [vmem:[%s1827_s17 + $0x4f8] sm:$0xff] %v734_v1  ;;  %v740_v13 = vmax.f32 %v340_v10, 0.0 }
  0x99   : > { %1135 = vst [vmem:[%s1827_s17 + $0x500] sm:$0xff] %v735_v2  ;;  %1136 = vst [vmem:[%s1827_s17 + $0x508] sm:$0xff] %v736_v3  ;;  %v741_v14 = vmax.f32 %v341_v11, 0.0  ;;  %v742_v15 = vmax.f32 %v342_v12, 0.0  ;;  %v343_v16 = vld [vmem:[%s1812_s12 + $0x540] sm:$0xff]  ;;  %v344_v17 = vld [vmem:[%s1812_s12 + $0x548] sm:$0xff] }
  0x9a   : > { %v345_v18 = vld [vmem:[%s1812_s12 + $0x550] sm:$0xff]  ;;  %1137 = vst [vmem:[%s1827_s17 + $0x510] sm:$0xff] %v737_v7  ;;  %1138 = vst [vmem:[%s1827_s17 + $0x518] sm:$0xff] %v738_v8  ;;  %v743_v19 = vmax.f32 %v343_v16, 0.0  ;;  %v744_v20 = vmax.f32 %v344_v17, 0.0  ;;  %v346_v22 = vld [vmem:[%s1812_s12 + $0x558] sm:$0xff] }
  0x9b   : > { %1139 = vst [vmem:[%s1827_s17 + $0x520] sm:$0xff] %v739_v9  ;;  %v745_v21 = vmax.f32 %v345_v18, 0.0  ;;  %v347_v23 = vld [vmem:[%s1812_s12 + $0x560] sm:$0xff]  ;;  %v348_v24 = vld [vmem:[%s1812_s12 + $0x568] sm:$0xff]  ;;  %1140 = vst [vmem:[%s1827_s17 + $0x528] sm:$0xff] %v740_v13  ;;  %v746_v25 = vmax.f32 %v346_v22, 0.0 }
  0x9c   : > { %1141 = vst [vmem:[%s1827_s17 + $0x530] sm:$0xff] %v741_v14  ;;  %1142 = vst [vmem:[%s1827_s17 + $0x538] sm:$0xff] %v742_v15  ;;  %v747_v26 = vmax.f32 %v347_v23, 0.0  ;;  %v748_v27 = vmax.f32 %v348_v24, 0.0  ;;  %v349_v28 = vld [vmem:[%s1812_s12 + $0x570] sm:$0xff]  ;;  %v350_v29 = vld [vmem:[%s1812_s12 + $0x578] sm:$0xff] }
  0x9d   : > { %v351_v30 = vld [vmem:[%s1812_s12 + $0x580] sm:$0xff]  ;;  %1143 = vst [vmem:[%s1827_s17 + $0x540] sm:$0xff] %v743_v19  ;;  %1144 = vst [vmem:[%s1827_s17 + $0x548] sm:$0xff] %v744_v20  ;;  %v749_v31 = vmax.f32 %v349_v28, 0.0  ;;  %v750_v32 = vmax.f32 %v350_v29, 0.0  ;;  %v352_v34 = vld [vmem:[%s1812_s12 + $0x588] sm:$0xff] }
  0x9e   : > { %1145 = vst [vmem:[%s1827_s17 + $0x550] sm:$0xff] %v745_v21  ;;  %v751_v33 = vmax.f32 %v351_v30, 0.0  ;;  %v353_v35 = vld [vmem:[%s1812_s12 + $0x590] sm:$0xff]  ;;  %v354_v36 = vld [vmem:[%s1812_s12 + $0x598] sm:$0xff]  ;;  %1146 = vst [vmem:[%s1827_s17 + $0x558] sm:$0xff] %v746_v25  ;;  %v752_v37 = vmax.f32 %v352_v34, 0.0 }
  0x9f   : > { %1147 = vst [vmem:[%s1827_s17 + $0x560] sm:$0xff] %v747_v26  ;;  %1148 = vst [vmem:[%s1827_s17 + $0x568] sm:$0xff] %v748_v27  ;;  %v753_v38 = vmax.f32 %v353_v35, 0.0  ;;  %v754_v39 = vmax.f32 %v354_v36, 0.0  ;;  %v355_v40 = vld [vmem:[%s1812_s12 + $0x5a0] sm:$0xff]  ;;  %v356_v41 = vld [vmem:[%s1812_s12 + $0x5a8] sm:$0xff] }
  0xa0   : > { %v357_v42 = vld [vmem:[%s1812_s12 + $0x5b0] sm:$0xff]  ;;  %1149 = vst [vmem:[%s1827_s17 + $0x570] sm:$0xff] %v749_v31  ;;  %1150 = vst [vmem:[%s1827_s17 + $0x578] sm:$0xff] %v750_v32  ;;  %v755_v43 = vmax.f32 %v355_v40, 0.0  ;;  %v756_v44 = vmax.f32 %v356_v41, 0.0  ;;  %v358_v46 = vld [vmem:[%s1812_s12 + $0x5b8] sm:$0xff] }
  0xa1   : > { %1151 = vst [vmem:[%s1827_s17 + $0x580] sm:$0xff] %v751_v33  ;;  %v757_v45 = vmax.f32 %v357_v42, 0.0  ;;  %v359_v47 = vld [vmem:[%s1812_s12 + $0x5c0] sm:$0xff]  ;;  %v360_v48 = vld [vmem:[%s1812_s12 + $0x5c8] sm:$0xff]  ;;  %1152 = vst [vmem:[%s1827_s17 + $0x588] sm:$0xff] %v752_v37  ;;  %v758_v49 = vmax.f32 %v358_v46, 0.0 }
  0xa2   : > { %1153 = vst [vmem:[%s1827_s17 + $0x590] sm:$0xff] %v753_v38  ;;  %1154 = vst [vmem:[%s1827_s17 + $0x598] sm:$0xff] %v754_v39  ;;  %v759_v50 = vmax.f32 %v359_v47, 0.0  ;;  %v760_v51 = vmax.f32 %v360_v48, 0.0  ;;  %v361_v52 = vld [vmem:[%s1812_s12 + $0x5d0] sm:$0xff]  ;;  %v362_v53 = vld [vmem:[%s1812_s12 + $0x5d8] sm:$0xff] }
  0xa3   : > { %v363_v54 = vld [vmem:[%s1812_s12 + $0x5e0] sm:$0xff]  ;;  %1155 = vst [vmem:[%s1827_s17 + $0x5a0] sm:$0xff] %v755_v43  ;;  %1156 = vst [vmem:[%s1827_s17 + $0x5a8] sm:$0xff] %v756_v44  ;;  %v761_v55 = vmax.f32 %v361_v52, 0.0  ;;  %v762_v56 = vmax.f32 %v362_v53, 0.0  ;;  %v364_v58 = vld [vmem:[%s1812_s12 + $0x5e8] sm:$0xff] }
  0xa4   : > { %1157 = vst [vmem:[%s1827_s17 + $0x5b0] sm:$0xff] %v757_v45  ;;  %v763_v57 = vmax.f32 %v363_v54, 0.0  ;;  %v365_v59 = vld [vmem:[%s1812_s12 + $0x5f0] sm:$0xff]  ;;  %v366_v60 = vld [vmem:[%s1812_s12 + $0x5f8] sm:$0xff]  ;;  %1158 = vst [vmem:[%s1827_s17 + $0x5b8] sm:$0xff] %v758_v49  ;;  %v764_v61 = vmax.f32 %v364_v58, 0.0 }
  0xa5   : > { %1159 = vst [vmem:[%s1827_s17 + $0x5c0] sm:$0xff] %v759_v50  ;;  %1160 = vst [vmem:[%s1827_s17 + $0x5c8] sm:$0xff] %v760_v51  ;;  %v765_v62 = vmax.f32 %v365_v59, 0.0  ;;  %v766_v63 = vmax.f32 %v366_v60, 0.0  ;;  %v367_v0 = vld [vmem:[%s1812_s12 + $0x600] sm:$0xff]  ;;  %v368_v1 = vld [vmem:[%s1812_s12 + $0x608] sm:$0xff] }
  0xa6   : > { %v369_v2 = vld [vmem:[%s1812_s12 + $0x610] sm:$0xff]  ;;  %1161 = vst [vmem:[%s1827_s17 + $0x5d0] sm:$0xff] %v761_v55  ;;  %1162 = vst [vmem:[%s1827_s17 + $0x5d8] sm:$0xff] %v762_v56  ;;  %v767_v3 = vmax.f32 %v367_v0, 0.0  ;;  %v768_v4 = vmax.f32 %v368_v1, 0.0  ;;  %v370_v6 = vld [vmem:[%s1812_s12 + $0x618] sm:$0xff] }
  0xa7   : > { %1163 = vst [vmem:[%s1827_s17 + $0x5e0] sm:$0xff] %v763_v57  ;;  %v769_v5 = vmax.f32 %v369_v2, 0.0  ;;  %v371_v7 = vld [vmem:[%s1812_s12 + $0x620] sm:$0xff]  ;;  %v372_v8 = vld [vmem:[%s1812_s12 + $0x628] sm:$0xff]  ;;  %1164 = vst [vmem:[%s1827_s17 + $0x5e8] sm:$0xff] %v764_v61  ;;  %v770_v9 = vmax.f32 %v370_v6, 0.0 }
  0xa8   : > { %1165 = vst [vmem:[%s1827_s17 + $0x5f0] sm:$0xff] %v765_v62  ;;  %1166 = vst [vmem:[%s1827_s17 + $0x5f8] sm:$0xff] %v766_v63  ;;  %v771_v10 = vmax.f32 %v371_v7, 0.0  ;;  %v772_v11 = vmax.f32 %v372_v8, 0.0  ;;  %v373_v12 = vld [vmem:[%s1812_s12 + $0x630] sm:$0xff]  ;;  %v374_v13 = vld [vmem:[%s1812_s12 + $0x638] sm:$0xff] }
  0xa9   : > { %v375_v14 = vld [vmem:[%s1812_s12 + $0x640] sm:$0xff]  ;;  %1167 = vst [vmem:[%s1827_s17 + $0x600] sm:$0xff] %v767_v3  ;;  %1168 = vst [vmem:[%s1827_s17 + $0x608] sm:$0xff] %v768_v4  ;;  %v773_v15 = vmax.f32 %v373_v12, 0.0  ;;  %v774_v16 = vmax.f32 %v374_v13, 0.0  ;;  %v376_v18 = vld [vmem:[%s1812_s12 + $0x648] sm:$0xff] }
  0xaa   : > { %1169 = vst [vmem:[%s1827_s17 + $0x610] sm:$0xff] %v769_v5  ;;  %v775_v17 = vmax.f32 %v375_v14, 0.0  ;;  %v377_v19 = vld [vmem:[%s1812_s12 + $0x650] sm:$0xff]  ;;  %v378_v20 = vld [vmem:[%s1812_s12 + $0x658] sm:$0xff]  ;;  %1170 = vst [vmem:[%s1827_s17 + $0x618] sm:$0xff] %v770_v9  ;;  %v776_v21 = vmax.f32 %v376_v18, 0.0 }
  0xab   : > { %1171 = vst [vmem:[%s1827_s17 + $0x620] sm:$0xff] %v771_v10  ;;  %1172 = vst [vmem:[%s1827_s17 + $0x628] sm:$0xff] %v772_v11  ;;  %v777_v22 = vmax.f32 %v377_v19, 0.0  ;;  %v778_v23 = vmax.f32 %v378_v20, 0.0  ;;  %v379_v24 = vld [vmem:[%s1812_s12 + $0x660] sm:$0xff]  ;;  %v380_v25 = vld [vmem:[%s1812_s12 + $0x668] sm:$0xff] }
  0xac   : > { %v381_v26 = vld [vmem:[%s1812_s12 + $0x670] sm:$0xff]  ;;  %1173 = vst [vmem:[%s1827_s17 + $0x630] sm:$0xff] %v773_v15  ;;  %1174 = vst [vmem:[%s1827_s17 + $0x638] sm:$0xff] %v774_v16  ;;  %v779_v27 = vmax.f32 %v379_v24, 0.0  ;;  %v780_v28 = vmax.f32 %v380_v25, 0.0  ;;  %v382_v30 = vld [vmem:[%s1812_s12 + $0x678] sm:$0xff] }
  0xad   : > { %1175 = vst [vmem:[%s1827_s17 + $0x640] sm:$0xff] %v775_v17  ;;  %v781_v29 = vmax.f32 %v381_v26, 0.0  ;;  %v383_v31 = vld [vmem:[%s1812_s12 + $0x680] sm:$0xff]  ;;  %v384_v32 = vld [vmem:[%s1812_s12 + $0x688] sm:$0xff]  ;;  %1176 = vst [vmem:[%s1827_s17 + $0x648] sm:$0xff] %v776_v21  ;;  %v782_v33 = vmax.f32 %v382_v30, 0.0 }
  0xae   : > { %1177 = vst [vmem:[%s1827_s17 + $0x650] sm:$0xff] %v777_v22  ;;  %1178 = vst [vmem:[%s1827_s17 + $0x658] sm:$0xff] %v778_v23  ;;  %v783_v34 = vmax.f32 %v383_v31, 0.0  ;;  %v784_v35 = vmax.f32 %v384_v32, 0.0  ;;  %v385_v36 = vld [vmem:[%s1812_s12 + $0x690] sm:$0xff]  ;;  %v386_v37 = vld [vmem:[%s1812_s12 + $0x698] sm:$0xff] }
  0xaf   : > { %v387_v38 = vld [vmem:[%s1812_s12 + $0x6a0] sm:$0xff]  ;;  %1179 = vst [vmem:[%s1827_s17 + $0x660] sm:$0xff] %v779_v27  ;;  %1180 = vst [vmem:[%s1827_s17 + $0x668] sm:$0xff] %v780_v28  ;;  %v785_v39 = vmax.f32 %v385_v36, 0.0  ;;  %v786_v40 = vmax.f32 %v386_v37, 0.0  ;;  %v388_v42 = vld [vmem:[%s1812_s12 + $0x6a8] sm:$0xff] }
  0xb0   : > { %1181 = vst [vmem:[%s1827_s17 + $0x670] sm:$0xff] %v781_v29  ;;  %v787_v41 = vmax.f32 %v387_v38, 0.0  ;;  %v389_v43 = vld [vmem:[%s1812_s12 + $0x6b0] sm:$0xff]  ;;  %v390_v44 = vld [vmem:[%s1812_s12 + $0x6b8] sm:$0xff]  ;;  %1182 = vst [vmem:[%s1827_s17 + $0x678] sm:$0xff] %v782_v33  ;;  %v788_v45 = vmax.f32 %v388_v42, 0.0 }
  0xb1   : > { %1183 = vst [vmem:[%s1827_s17 + $0x680] sm:$0xff] %v783_v34  ;;  %1184 = vst [vmem:[%s1827_s17 + $0x688] sm:$0xff] %v784_v35  ;;  %v789_v46 = vmax.f32 %v389_v43, 0.0  ;;  %v790_v47 = vmax.f32 %v390_v44, 0.0  ;;  %v391_v48 = vld [vmem:[%s1812_s12 + $0x6c0] sm:$0xff]  ;;  %v392_v49 = vld [vmem:[%s1812_s12 + $0x6c8] sm:$0xff] }
  0xb2   : > { %v393_v50 = vld [vmem:[%s1812_s12 + $0x6d0] sm:$0xff]  ;;  %1185 = vst [vmem:[%s1827_s17 + $0x690] sm:$0xff] %v785_v39  ;;  %1186 = vst [vmem:[%s1827_s17 + $0x698] sm:$0xff] %v786_v40  ;;  %v791_v51 = vmax.f32 %v391_v48, 0.0  ;;  %v792_v52 = vmax.f32 %v392_v49, 0.0  ;;  %v394_v54 = vld [vmem:[%s1812_s12 + $0x6d8] sm:$0xff] }
  0xb3   : > { %1187 = vst [vmem:[%s1827_s17 + $0x6a0] sm:$0xff] %v787_v41  ;;  %v793_v53 = vmax.f32 %v393_v50, 0.0  ;;  %v395_v55 = vld [vmem:[%s1812_s12 + $0x6e0] sm:$0xff]  ;;  %v396_v56 = vld [vmem:[%s1812_s12 + $0x6e8] sm:$0xff]  ;;  %1188 = vst [vmem:[%s1827_s17 + $0x6a8] sm:$0xff] %v788_v45  ;;  %v794_v57 = vmax.f32 %v394_v54, 0.0 }
  0xb4   : > { %1189 = vst [vmem:[%s1827_s17 + $0x6b0] sm:$0xff] %v789_v46  ;;  %1190 = vst [vmem:[%s1827_s17 + $0x6b8] sm:$0xff] %v790_v47  ;;  %v795_v58 = vmax.f32 %v395_v55, 0.0  ;;  %v796_v59 = vmax.f32 %v396_v56, 0.0  ;;  %v397_v60 = vld [vmem:[%s1812_s12 + $0x6f0] sm:$0xff]  ;;  %v398_v61 = vld [vmem:[%s1812_s12 + $0x6f8] sm:$0xff] }
  0xb5   : > { %v399_v62 = vld [vmem:[%s1812_s12 + $0x700] sm:$0xff]  ;;  %1191 = vst [vmem:[%s1827_s17 + $0x6c0] sm:$0xff] %v791_v51  ;;  %1192 = vst [vmem:[%s1827_s17 + $0x6c8] sm:$0xff] %v792_v52  ;;  %v797_v63 = vmax.f32 %v397_v60, 0.0  ;;  %v798_v0 = vmax.f32 %v398_v61, 0.0  ;;  %v400_v2 = vld [vmem:[%s1812_s12 + $0x708] sm:$0xff] }
  0xb6   : > { %1193 = vst [vmem:[%s1827_s17 + $0x6d0] sm:$0xff] %v793_v53  ;;  %v799_v1 = vmax.f32 %v399_v62, 0.0  ;;  %v401_v3 = vld [vmem:[%s1812_s12 + $0x710] sm:$0xff]  ;;  %v402_v4 = vld [vmem:[%s1812_s12 + $0x718] sm:$0xff]  ;;  %1194 = vst [vmem:[%s1827_s17 + $0x6d8] sm:$0xff] %v794_v57  ;;  %v800_v5 = vmax.f32 %v400_v2, 0.0 }
  0xb7   : > { %1195 = vst [vmem:[%s1827_s17 + $0x6e0] sm:$0xff] %v795_v58  ;;  %1196 = vst [vmem:[%s1827_s17 + $0x6e8] sm:$0xff] %v796_v59  ;;  %v801_v6 = vmax.f32 %v401_v3, 0.0  ;;  %v802_v7 = vmax.f32 %v402_v4, 0.0  ;;  %v403_v8 = vld [vmem:[%s1812_s12 + $0x720] sm:$0xff]  ;;  %v404_v9 = vld [vmem:[%s1812_s12 + $0x728] sm:$0xff] }
  0xb8   : > { %v405_v10 = vld [vmem:[%s1812_s12 + $0x730] sm:$0xff]  ;;  %1197 = vst [vmem:[%s1827_s17 + $0x6f0] sm:$0xff] %v797_v63  ;;  %1198 = vst [vmem:[%s1827_s17 + $0x6f8] sm:$0xff] %v798_v0  ;;  %v803_v11 = vmax.f32 %v403_v8, 0.0  ;;  %v804_v12 = vmax.f32 %v404_v9, 0.0  ;;  %v406_v14 = vld [vmem:[%s1812_s12 + $0x738] sm:$0xff] }
  0xb9   : > { %1199 = vst [vmem:[%s1827_s17 + $0x700] sm:$0xff] %v799_v1  ;;  %v805_v13 = vmax.f32 %v405_v10, 0.0  ;;  %v407_v15 = vld [vmem:[%s1812_s12 + $0x740] sm:$0xff]  ;;  %v408_v16 = vld [vmem:[%s1812_s12 + $0x748] sm:$0xff]  ;;  %1200 = vst [vmem:[%s1827_s17 + $0x708] sm:$0xff] %v800_v5  ;;  %v806_v17 = vmax.f32 %v406_v14, 0.0 }
  0xba   : > { %1201 = vst [vmem:[%s1827_s17 + $0x710] sm:$0xff] %v801_v6  ;;  %1202 = vst [vmem:[%s1827_s17 + $0x718] sm:$0xff] %v802_v7  ;;  %v807_v18 = vmax.f32 %v407_v15, 0.0  ;;  %v808_v19 = vmax.f32 %v408_v16, 0.0  ;;  %v409_v20 = vld [vmem:[%s1812_s12 + $0x750] sm:$0xff]  ;;  %v410_v21 = vld [vmem:[%s1812_s12 + $0x758] sm:$0xff] }
  0xbb   : > { %v411_v22 = vld [vmem:[%s1812_s12 + $0x760] sm:$0xff]  ;;  %1203 = vst [vmem:[%s1827_s17 + $0x720] sm:$0xff] %v803_v11  ;;  %1204 = vst [vmem:[%s1827_s17 + $0x728] sm:$0xff] %v804_v12  ;;  %v809_v23 = vmax.f32 %v409_v20, 0.0  ;;  %v810_v24 = vmax.f32 %v410_v21, 0.0  ;;  %v412_v26 = vld [vmem:[%s1812_s12 + $0x768] sm:$0xff] }
  0xbc   : > { %1205 = vst [vmem:[%s1827_s17 + $0x730] sm:$0xff] %v805_v13  ;;  %v811_v25 = vmax.f32 %v411_v22, 0.0  ;;  %v413_v27 = vld [vmem:[%s1812_s12 + $0x770] sm:$0xff]  ;;  %v414_v28 = vld [vmem:[%s1812_s12 + $0x778] sm:$0xff]  ;;  %1206 = vst [vmem:[%s1827_s17 + $0x738] sm:$0xff] %v806_v17  ;;  %v812_v29 = vmax.f32 %v412_v26, 0.0 }
  0xbd   : > { %1207 = vst [vmem:[%s1827_s17 + $0x740] sm:$0xff] %v807_v18  ;;  %1208 = vst [vmem:[%s1827_s17 + $0x748] sm:$0xff] %v808_v19  ;;  %v813_v30 = vmax.f32 %v413_v27, 0.0  ;;  %v814_v31 = vmax.f32 %v414_v28, 0.0  ;;  %v415_v32 = vld [vmem:[%s1812_s12 + $0x780] sm:$0xff]  ;;  %v416_v33 = vld [vmem:[%s1812_s12 + $0x788] sm:$0xff] }
  0xbe   : > { %v417_v34 = vld [vmem:[%s1812_s12 + $0x790] sm:$0xff]  ;;  %1209 = vst [vmem:[%s1827_s17 + $0x750] sm:$0xff] %v809_v23  ;;  %1210 = vst [vmem:[%s1827_s17 + $0x758] sm:$0xff] %v810_v24  ;;  %v815_v35 = vmax.f32 %v415_v32, 0.0  ;;  %v816_v36 = vmax.f32 %v416_v33, 0.0  ;;  %v418_v38 = vld [vmem:[%s1812_s12 + $0x798] sm:$0xff] }
  0xbf   : > { %1211 = vst [vmem:[%s1827_s17 + $0x760] sm:$0xff] %v811_v25  ;;  %v817_v37 = vmax.f32 %v417_v34, 0.0  ;;  %v419_v39 = vld [vmem:[%s1812_s12 + $0x7a0] sm:$0xff]  ;;  %v420_v40 = vld [vmem:[%s1812_s12 + $0x7a8] sm:$0xff]  ;;  %1212 = vst [vmem:[%s1827_s17 + $0x768] sm:$0xff] %v812_v29  ;;  %v818_v41 = vmax.f32 %v418_v38, 0.0 }
  0xc0   : > { %1213 = vst [vmem:[%s1827_s17 + $0x770] sm:$0xff] %v813_v30  ;;  %1214 = vst [vmem:[%s1827_s17 + $0x778] sm:$0xff] %v814_v31  ;;  %v819_v42 = vmax.f32 %v419_v39, 0.0  ;;  %v820_v43 = vmax.f32 %v420_v40, 0.0  ;;  %v421_v44 = vld [vmem:[%s1812_s12 + $0x7b0] sm:$0xff]  ;;  %v422_v45 = vld [vmem:[%s1812_s12 + $0x7b8] sm:$0xff] }
  0xc1   : > { %v423_v46 = vld [vmem:[%s1812_s12 + $0x7c0] sm:$0xff]  ;;  %1215 = vst [vmem:[%s1827_s17 + $0x780] sm:$0xff] %v815_v35  ;;  %1216 = vst [vmem:[%s1827_s17 + $0x788] sm:$0xff] %v816_v36  ;;  %v821_v47 = vmax.f32 %v421_v44, 0.0  ;;  %v822_v48 = vmax.f32 %v422_v45, 0.0  ;;  %v424_v50 = vld [vmem:[%s1812_s12 + $0x7c8] sm:$0xff] }
  0xc2   : > { %1217 = vst [vmem:[%s1827_s17 + $0x790] sm:$0xff] %v817_v37  ;;  %v823_v49 = vmax.f32 %v423_v46, 0.0  ;;  %v425_v51 = vld [vmem:[%s1812_s12 + $0x7d0] sm:$0xff]  ;;  %v426_v52 = vld [vmem:[%s1812_s12 + $0x7d8] sm:$0xff]  ;;  %1218 = vst [vmem:[%s1827_s17 + $0x798] sm:$0xff] %v818_v41  ;;  %v824_v53 = vmax.f32 %v424_v50, 0.0 }
  0xc3   : > { %1219 = vst [vmem:[%s1827_s17 + $0x7a0] sm:$0xff] %v819_v42  ;;  %1220 = vst [vmem:[%s1827_s17 + $0x7a8] sm:$0xff] %v820_v43  ;;  %v825_v54 = vmax.f32 %v425_v51, 0.0  ;;  %v826_v55 = vmax.f32 %v426_v52, 0.0  ;;  %v427_v56 = vld [vmem:[%s1812_s12 + $0x7e0] sm:$0xff]  ;;  %v428_v57 = vld [vmem:[%s1812_s12 + $0x7e8] sm:$0xff] }
  0xc4   : > { %v429_v58 = vld [vmem:[%s1812_s12 + $0x7f0] sm:$0xff]  ;;  %1221 = vst [vmem:[%s1827_s17 + $0x7b0] sm:$0xff] %v821_v47  ;;  %1222 = vst [vmem:[%s1827_s17 + $0x7b8] sm:$0xff] %v822_v48  ;;  %v827_v59 = vmax.f32 %v427_v56, 0.0  ;;  %v828_v60 = vmax.f32 %v428_v57, 0.0  ;;  %v430_v62 = vld [vmem:[%s1812_s12 + $0x7f8] sm:$0xff] }
  0xc5   : > { %1223 = vst [vmem:[%s1827_s17 + $0x7c0] sm:$0xff] %v823_v49  ;;  %v829_v61 = vmax.f32 %v429_v58, 0.0  ;;  %v431_v63 = vld [vmem:[%s1812_s12 + $0x800] sm:$0xff]  ;;  %v432_v0 = vld [vmem:[%s1812_s12 + $0x808] sm:$0xff]  ;;  %1224 = vst [vmem:[%s1827_s17 + $0x7c8] sm:$0xff] %v824_v53  ;;  %v830_v1 = vmax.f32 %v430_v62, 0.0 }
  0xc6   : > { %1225 = vst [vmem:[%s1827_s17 + $0x7d0] sm:$0xff] %v825_v54  ;;  %1226 = vst [vmem:[%s1827_s17 + $0x7d8] sm:$0xff] %v826_v55  ;;  %v831_v2 = vmax.f32 %v431_v63, 0.0  ;;  %v832_v3 = vmax.f32 %v432_v0, 0.0  ;;  %v433_v4 = vld [vmem:[%s1812_s12 + $0x810] sm:$0xff]  ;;  %v434_v5 = vld [vmem:[%s1812_s12 + $0x818] sm:$0xff] }
  0xc7   : > { %v435_v6 = vld [vmem:[%s1812_s12 + $0x820] sm:$0xff]  ;;  %1227 = vst [vmem:[%s1827_s17 + $0x7e0] sm:$0xff] %v827_v59  ;;  %1228 = vst [vmem:[%s1827_s17 + $0x7e8] sm:$0xff] %v828_v60  ;;  %v833_v7 = vmax.f32 %v433_v4, 0.0  ;;  %v834_v8 = vmax.f32 %v434_v5, 0.0  ;;  %v436_v10 = vld [vmem:[%s1812_s12 + $0x828] sm:$0xff] }
  0xc8   : > { %1229 = vst [vmem:[%s1827_s17 + $0x7f0] sm:$0xff] %v829_v61  ;;  %v835_v9 = vmax.f32 %v435_v6, 0.0  ;;  %v437_v11 = vld [vmem:[%s1812_s12 + $0x830] sm:$0xff]  ;;  %v438_v12 = vld [vmem:[%s1812_s12 + $0x838] sm:$0xff]  ;;  %1230 = vst [vmem:[%s1827_s17 + $0x7f8] sm:$0xff] %v830_v1  ;;  %v836_v13 = vmax.f32 %v436_v10, 0.0 }
  0xc9   : > { %1231 = vst [vmem:[%s1827_s17 + $0x800] sm:$0xff] %v831_v2  ;;  %1232 = vst [vmem:[%s1827_s17 + $0x808] sm:$0xff] %v832_v3  ;;  %v837_v14 = vmax.f32 %v437_v11, 0.0  ;;  %v838_v15 = vmax.f32 %v438_v12, 0.0  ;;  %v439_v16 = vld [vmem:[%s1812_s12 + $0x840] sm:$0xff]  ;;  %v440_v17 = vld [vmem:[%s1812_s12 + $0x848] sm:$0xff] }
  0xca   : > { %v441_v18 = vld [vmem:[%s1812_s12 + $0x850] sm:$0xff]  ;;  %1233 = vst [vmem:[%s1827_s17 + $0x810] sm:$0xff] %v833_v7  ;;  %1234 = vst [vmem:[%s1827_s17 + $0x818] sm:$0xff] %v834_v8  ;;  %v839_v19 = vmax.f32 %v439_v16, 0.0  ;;  %v840_v20 = vmax.f32 %v440_v17, 0.0  ;;  %v442_v22 = vld [vmem:[%s1812_s12 + $0x858] sm:$0xff] }
  0xcb   : > { %1235 = vst [vmem:[%s1827_s17 + $0x820] sm:$0xff] %v835_v9  ;;  %v841_v21 = vmax.f32 %v441_v18, 0.0  ;;  %v443_v23 = vld [vmem:[%s1812_s12 + $0x860] sm:$0xff]  ;;  %v444_v24 = vld [vmem:[%s1812_s12 + $0x868] sm:$0xff]  ;;  %1236 = vst [vmem:[%s1827_s17 + $0x828] sm:$0xff] %v836_v13  ;;  %v842_v25 = vmax.f32 %v442_v22, 0.0 }
  0xcc   : > { %1237 = vst [vmem:[%s1827_s17 + $0x830] sm:$0xff] %v837_v14  ;;  %1238 = vst [vmem:[%s1827_s17 + $0x838] sm:$0xff] %v838_v15  ;;  %v843_v26 = vmax.f32 %v443_v23, 0.0  ;;  %v844_v27 = vmax.f32 %v444_v24, 0.0  ;;  %v445_v28 = vld [vmem:[%s1812_s12 + $0x870] sm:$0xff]  ;;  %v446_v29 = vld [vmem:[%s1812_s12 + $0x878] sm:$0xff] }
  0xcd   : > { %v447_v30 = vld [vmem:[%s1812_s12 + $0x880] sm:$0xff]  ;;  %1239 = vst [vmem:[%s1827_s17 + $0x840] sm:$0xff] %v839_v19  ;;  %1240 = vst [vmem:[%s1827_s17 + $0x848] sm:$0xff] %v840_v20  ;;  %v845_v31 = vmax.f32 %v445_v28, 0.0  ;;  %v846_v32 = vmax.f32 %v446_v29, 0.0  ;;  %v448_v34 = vld [vmem:[%s1812_s12 + $0x888] sm:$0xff] }
  0xce   : > { %1241 = vst [vmem:[%s1827_s17 + $0x850] sm:$0xff] %v841_v21  ;;  %v847_v33 = vmax.f32 %v447_v30, 0.0  ;;  %v449_v35 = vld [vmem:[%s1812_s12 + $0x890] sm:$0xff]  ;;  %v450_v36 = vld [vmem:[%s1812_s12 + $0x898] sm:$0xff]  ;;  %1242 = vst [vmem:[%s1827_s17 + $0x858] sm:$0xff] %v842_v25  ;;  %v848_v37 = vmax.f32 %v448_v34, 0.0 }
  0xcf   : > { %1243 = vst [vmem:[%s1827_s17 + $0x860] sm:$0xff] %v843_v26  ;;  %1244 = vst [vmem:[%s1827_s17 + $0x868] sm:$0xff] %v844_v27  ;;  %v849_v38 = vmax.f32 %v449_v35, 0.0  ;;  %v850_v39 = vmax.f32 %v450_v36, 0.0  ;;  %v451_v40 = vld [vmem:[%s1812_s12 + $0x8a0] sm:$0xff]  ;;  %v452_v41 = vld [vmem:[%s1812_s12 + $0x8a8] sm:$0xff] }
  0xd0   : > { %v453_v42 = vld [vmem:[%s1812_s12 + $0x8b0] sm:$0xff]  ;;  %1245 = vst [vmem:[%s1827_s17 + $0x870] sm:$0xff] %v845_v31  ;;  %1246 = vst [vmem:[%s1827_s17 + $0x878] sm:$0xff] %v846_v32  ;;  %v851_v43 = vmax.f32 %v451_v40, 0.0  ;;  %v852_v44 = vmax.f32 %v452_v41, 0.0  ;;  %v454_v46 = vld [vmem:[%s1812_s12 + $0x8b8] sm:$0xff] }
  0xd1   : > { %1247 = vst [vmem:[%s1827_s17 + $0x880] sm:$0xff] %v847_v33  ;;  %v853_v45 = vmax.f32 %v453_v42, 0.0  ;;  %v455_v47 = vld [vmem:[%s1812_s12 + $0x8c0] sm:$0xff]  ;;  %v456_v48 = vld [vmem:[%s1812_s12 + $0x8c8] sm:$0xff]  ;;  %1248 = vst [vmem:[%s1827_s17 + $0x888] sm:$0xff] %v848_v37  ;;  %v854_v49 = vmax.f32 %v454_v46, 0.0 }
  0xd2   : > { %1249 = vst [vmem:[%s1827_s17 + $0x890] sm:$0xff] %v849_v38  ;;  %1250 = vst [vmem:[%s1827_s17 + $0x898] sm:$0xff] %v850_v39  ;;  %v855_v50 = vmax.f32 %v455_v47, 0.0  ;;  %v856_v51 = vmax.f32 %v456_v48, 0.0  ;;  %v457_v52 = vld [vmem:[%s1812_s12 + $0x8d0] sm:$0xff]  ;;  %v458_v53 = vld [vmem:[%s1812_s12 + $0x8d8] sm:$0xff] }
  0xd3   : > { %v459_v54 = vld [vmem:[%s1812_s12 + $0x8e0] sm:$0xff]  ;;  %1251 = vst [vmem:[%s1827_s17 + $0x8a0] sm:$0xff] %v851_v43  ;;  %1252 = vst [vmem:[%s1827_s17 + $0x8a8] sm:$0xff] %v852_v44  ;;  %v857_v55 = vmax.f32 %v457_v52, 0.0  ;;  %v858_v56 = vmax.f32 %v458_v53, 0.0  ;;  %v460_v58 = vld [vmem:[%s1812_s12 + $0x8e8] sm:$0xff] }
  0xd4   : > { %1253 = vst [vmem:[%s1827_s17 + $0x8b0] sm:$0xff] %v853_v45  ;;  %v859_v57 = vmax.f32 %v459_v54, 0.0  ;;  %v461_v59 = vld [vmem:[%s1812_s12 + $0x8f0] sm:$0xff]  ;;  %v462_v60 = vld [vmem:[%s1812_s12 + $0x8f8] sm:$0xff]  ;;  %1254 = vst [vmem:[%s1827_s17 + $0x8b8] sm:$0xff] %v854_v49  ;;  %v860_v61 = vmax.f32 %v460_v58, 0.0 }
  0xd5   : > { %1255 = vst [vmem:[%s1827_s17 + $0x8c0] sm:$0xff] %v855_v50  ;;  %1256 = vst [vmem:[%s1827_s17 + $0x8c8] sm:$0xff] %v856_v51  ;;  %v861_v62 = vmax.f32 %v461_v59, 0.0  ;;  %v862_v63 = vmax.f32 %v462_v60, 0.0  ;;  %v463_v0 = vld [vmem:[%s1812_s12 + $0x900] sm:$0xff]  ;;  %v464_v1 = vld [vmem:[%s1812_s12 + $0x908] sm:$0xff] }
  0xd6   : > { %v465_v2 = vld [vmem:[%s1812_s12 + $0x910] sm:$0xff]  ;;  %1257 = vst [vmem:[%s1827_s17 + $0x8d0] sm:$0xff] %v857_v55  ;;  %1258 = vst [vmem:[%s1827_s17 + $0x8d8] sm:$0xff] %v858_v56  ;;  %v863_v3 = vmax.f32 %v463_v0, 0.0  ;;  %v864_v4 = vmax.f32 %v464_v1, 0.0  ;;  %v466_v6 = vld [vmem:[%s1812_s12 + $0x918] sm:$0xff] }
  0xd7   : > { %1259 = vst [vmem:[%s1827_s17 + $0x8e0] sm:$0xff] %v859_v57  ;;  %v865_v5 = vmax.f32 %v465_v2, 0.0  ;;  %v467_v7 = vld [vmem:[%s1812_s12 + $0x920] sm:$0xff]  ;;  %v468_v8 = vld [vmem:[%s1812_s12 + $0x928] sm:$0xff]  ;;  %1260 = vst [vmem:[%s1827_s17 + $0x8e8] sm:$0xff] %v860_v61  ;;  %v866_v9 = vmax.f32 %v466_v6, 0.0 }
  0xd8   : > { %1261 = vst [vmem:[%s1827_s17 + $0x8f0] sm:$0xff] %v861_v62  ;;  %1262 = vst [vmem:[%s1827_s17 + $0x8f8] sm:$0xff] %v862_v63  ;;  %v867_v10 = vmax.f32 %v467_v7, 0.0  ;;  %v868_v11 = vmax.f32 %v468_v8, 0.0  ;;  %v469_v12 = vld [vmem:[%s1812_s12 + $0x930] sm:$0xff]  ;;  %v470_v13 = vld [vmem:[%s1812_s12 + $0x938] sm:$0xff] }
  0xd9   : > { %v471_v14 = vld [vmem:[%s1812_s12 + $0x940] sm:$0xff]  ;;  %1263 = vst [vmem:[%s1827_s17 + $0x900] sm:$0xff] %v863_v3  ;;  %1264 = vst [vmem:[%s1827_s17 + $0x908] sm:$0xff] %v864_v4  ;;  %v869_v15 = vmax.f32 %v469_v12, 0.0  ;;  %v870_v16 = vmax.f32 %v470_v13, 0.0  ;;  %v472_v18 = vld [vmem:[%s1812_s12 + $0x948] sm:$0xff] }
  0xda   : > { %1265 = vst [vmem:[%s1827_s17 + $0x910] sm:$0xff] %v865_v5  ;;  %v871_v17 = vmax.f32 %v471_v14, 0.0  ;;  %v473_v19 = vld [vmem:[%s1812_s12 + $0x950] sm:$0xff]  ;;  %v474_v20 = vld [vmem:[%s1812_s12 + $0x958] sm:$0xff]  ;;  %1266 = vst [vmem:[%s1827_s17 + $0x918] sm:$0xff] %v866_v9  ;;  %v872_v21 = vmax.f32 %v472_v18, 0.0 }
  0xdb   : > { %1267 = vst [vmem:[%s1827_s17 + $0x920] sm:$0xff] %v867_v10  ;;  %1268 = vst [vmem:[%s1827_s17 + $0x928] sm:$0xff] %v868_v11  ;;  %v873_v22 = vmax.f32 %v473_v19, 0.0  ;;  %v874_v23 = vmax.f32 %v474_v20, 0.0  ;;  %v475_v24 = vld [vmem:[%s1812_s12 + $0x960] sm:$0xff]  ;;  %v476_v25 = vld [vmem:[%s1812_s12 + $0x968] sm:$0xff] }
  0xdc   : > { %v477_v26 = vld [vmem:[%s1812_s12 + $0x970] sm:$0xff]  ;;  %1269 = vst [vmem:[%s1827_s17 + $0x930] sm:$0xff] %v869_v15  ;;  %1270 = vst [vmem:[%s1827_s17 + $0x938] sm:$0xff] %v870_v16  ;;  %v875_v27 = vmax.f32 %v475_v24, 0.0  ;;  %v876_v28 = vmax.f32 %v476_v25, 0.0  ;;  %v478_v30 = vld [vmem:[%s1812_s12 + $0x978] sm:$0xff] }
  0xdd   : > { %1271 = vst [vmem:[%s1827_s17 + $0x940] sm:$0xff] %v871_v17  ;;  %v877_v29 = vmax.f32 %v477_v26, 0.0  ;;  %v479_v31 = vld [vmem:[%s1812_s12 + $0x980] sm:$0xff]  ;;  %v480_v32 = vld [vmem:[%s1812_s12 + $0x988] sm:$0xff]  ;;  %1272 = vst [vmem:[%s1827_s17 + $0x948] sm:$0xff] %v872_v21  ;;  %v878_v33 = vmax.f32 %v478_v30, 0.0 }
  0xde   : > { %1273 = vst [vmem:[%s1827_s17 + $0x950] sm:$0xff] %v873_v22  ;;  %1274 = vst [vmem:[%s1827_s17 + $0x958] sm:$0xff] %v874_v23  ;;  %v879_v34 = vmax.f32 %v479_v31, 0.0  ;;  %v880_v35 = vmax.f32 %v480_v32, 0.0  ;;  %v481_v36 = vld [vmem:[%s1812_s12 + $0x990] sm:$0xff]  ;;  %v482_v37 = vld [vmem:[%s1812_s12 + $0x998] sm:$0xff] }
  0xdf   : > { %v483_v38 = vld [vmem:[%s1812_s12 + $0x9a0] sm:$0xff]  ;;  %1275 = vst [vmem:[%s1827_s17 + $0x960] sm:$0xff] %v875_v27  ;;  %1276 = vst [vmem:[%s1827_s17 + $0x968] sm:$0xff] %v876_v28  ;;  %v881_v39 = vmax.f32 %v481_v36, 0.0  ;;  %v882_v40 = vmax.f32 %v482_v37, 0.0  ;;  %v484_v42 = vld [vmem:[%s1812_s12 + $0x9a8] sm:$0xff] }
  0xe0   : > { %1277 = vst [vmem:[%s1827_s17 + $0x970] sm:$0xff] %v877_v29  ;;  %v883_v41 = vmax.f32 %v483_v38, 0.0  ;;  %v485_v43 = vld [vmem:[%s1812_s12 + $0x9b0] sm:$0xff]  ;;  %v486_v44 = vld [vmem:[%s1812_s12 + $0x9b8] sm:$0xff]  ;;  %1278 = vst [vmem:[%s1827_s17 + $0x978] sm:$0xff] %v878_v33  ;;  %v884_v45 = vmax.f32 %v484_v42, 0.0 }
  0xe1   : > { %1279 = vst [vmem:[%s1827_s17 + $0x980] sm:$0xff] %v879_v34  ;;  %1280 = vst [vmem:[%s1827_s17 + $0x988] sm:$0xff] %v880_v35  ;;  %v885_v46 = vmax.f32 %v485_v43, 0.0  ;;  %v886_v47 = vmax.f32 %v486_v44, 0.0  ;;  %v487_v48 = vld [vmem:[%s1812_s12 + $0x9c0] sm:$0xff]  ;;  %v488_v49 = vld [vmem:[%s1812_s12 + $0x9c8] sm:$0xff] }
  0xe2   : > { %v489_v50 = vld [vmem:[%s1812_s12 + $0x9d0] sm:$0xff]  ;;  %1281 = vst [vmem:[%s1827_s17 + $0x990] sm:$0xff] %v881_v39  ;;  %1282 = vst [vmem:[%s1827_s17 + $0x998] sm:$0xff] %v882_v40  ;;  %v887_v51 = vmax.f32 %v487_v48, 0.0  ;;  %v888_v52 = vmax.f32 %v488_v49, 0.0  ;;  %v490_v54 = vld [vmem:[%s1812_s12 + $0x9d8] sm:$0xff] }
  0xe3   : > { %1283 = vst [vmem:[%s1827_s17 + $0x9a0] sm:$0xff] %v883_v41  ;;  %v889_v53 = vmax.f32 %v489_v50, 0.0  ;;  %v491_v55 = vld [vmem:[%s1812_s12 + $0x9e0] sm:$0xff]  ;;  %v492_v56 = vld [vmem:[%s1812_s12 + $0x9e8] sm:$0xff]  ;;  %1284 = vst [vmem:[%s1827_s17 + $0x9a8] sm:$0xff] %v884_v45  ;;  %v890_v57 = vmax.f32 %v490_v54, 0.0 }
  0xe4   : > { %1285 = vst [vmem:[%s1827_s17 + $0x9b0] sm:$0xff] %v885_v46  ;;  %1286 = vst [vmem:[%s1827_s17 + $0x9b8] sm:$0xff] %v886_v47  ;;  %v891_v58 = vmax.f32 %v491_v55, 0.0  ;;  %v892_v59 = vmax.f32 %v492_v56, 0.0  ;;  %v493_v60 = vld [vmem:[%s1812_s12 + $0x9f0] sm:$0xff]  ;;  %v494_v61 = vld [vmem:[%s1812_s12 + $0x9f8] sm:$0xff] }
  0xe5   : > { %v495_v62 = vld [vmem:[%s1812_s12 + $0xa00] sm:$0xff]  ;;  %1287 = vst [vmem:[%s1827_s17 + $0x9c0] sm:$0xff] %v887_v51  ;;  %1288 = vst [vmem:[%s1827_s17 + $0x9c8] sm:$0xff] %v888_v52  ;;  %v893_v63 = vmax.f32 %v493_v60, 0.0  ;;  %v894_v0 = vmax.f32 %v494_v61, 0.0  ;;  %v496_v2 = vld [vmem:[%s1812_s12 + $0xa08] sm:$0xff] }
  0xe6   : > { %1289 = vst [vmem:[%s1827_s17 + $0x9d0] sm:$0xff] %v889_v53  ;;  %v895_v1 = vmax.f32 %v495_v62, 0.0  ;;  %v497_v3 = vld [vmem:[%s1812_s12 + $0xa10] sm:$0xff]  ;;  %v498_v4 = vld [vmem:[%s1812_s12 + $0xa18] sm:$0xff]  ;;  %1290 = vst [vmem:[%s1827_s17 + $0x9d8] sm:$0xff] %v890_v57  ;;  %v896_v5 = vmax.f32 %v496_v2, 0.0 }
  0xe7   : > { %1291 = vst [vmem:[%s1827_s17 + $0x9e0] sm:$0xff] %v891_v58  ;;  %1292 = vst [vmem:[%s1827_s17 + $0x9e8] sm:$0xff] %v892_v59  ;;  %v897_v6 = vmax.f32 %v497_v3, 0.0  ;;  %v898_v7 = vmax.f32 %v498_v4, 0.0  ;;  %v499_v8 = vld [vmem:[%s1812_s12 + $0xa20] sm:$0xff]  ;;  %v500_v9 = vld [vmem:[%s1812_s12 + $0xa28] sm:$0xff] }
  0xe8   : > { %v501_v10 = vld [vmem:[%s1812_s12 + $0xa30] sm:$0xff]  ;;  %1293 = vst [vmem:[%s1827_s17 + $0x9f0] sm:$0xff] %v893_v63  ;;  %1294 = vst [vmem:[%s1827_s17 + $0x9f8] sm:$0xff] %v894_v0  ;;  %v899_v11 = vmax.f32 %v499_v8, 0.0  ;;  %v900_v12 = vmax.f32 %v500_v9, 0.0  ;;  %v502_v14 = vld [vmem:[%s1812_s12 + $0xa38] sm:$0xff] }
  0xe9   : > { %1295 = vst [vmem:[%s1827_s17 + $0xa00] sm:$0xff] %v895_v1  ;;  %v901_v13 = vmax.f32 %v501_v10, 0.0  ;;  %v503_v15 = vld [vmem:[%s1812_s12 + $0xa40] sm:$0xff]  ;;  %v504_v16 = vld [vmem:[%s1812_s12 + $0xa48] sm:$0xff]  ;;  %1296 = vst [vmem:[%s1827_s17 + $0xa08] sm:$0xff] %v896_v5  ;;  %v902_v17 = vmax.f32 %v502_v14, 0.0 }
  0xea   : > { %1297 = vst [vmem:[%s1827_s17 + $0xa10] sm:$0xff] %v897_v6  ;;  %1298 = vst [vmem:[%s1827_s17 + $0xa18] sm:$0xff] %v898_v7  ;;  %v903_v18 = vmax.f32 %v503_v15, 0.0  ;;  %v904_v19 = vmax.f32 %v504_v16, 0.0  ;;  %v505_v20 = vld [vmem:[%s1812_s12 + $0xa50] sm:$0xff]  ;;  %v506_v21 = vld [vmem:[%s1812_s12 + $0xa58] sm:$0xff] }
  0xeb   : > { %v507_v22 = vld [vmem:[%s1812_s12 + $0xa60] sm:$0xff]  ;;  %1299 = vst [vmem:[%s1827_s17 + $0xa20] sm:$0xff] %v899_v11  ;;  %1300 = vst [vmem:[%s1827_s17 + $0xa28] sm:$0xff] %v900_v12  ;;  %v905_v23 = vmax.f32 %v505_v20, 0.0  ;;  %v906_v24 = vmax.f32 %v506_v21, 0.0  ;;  %v508_v26 = vld [vmem:[%s1812_s12 + $0xa68] sm:$0xff] }
  0xec   : > { %1301 = vst [vmem:[%s1827_s17 + $0xa30] sm:$0xff] %v901_v13  ;;  %v907_v25 = vmax.f32 %v507_v22, 0.0  ;;  %v509_v27 = vld [vmem:[%s1812_s12 + $0xa70] sm:$0xff]  ;;  %v510_v28 = vld [vmem:[%s1812_s12 + $0xa78] sm:$0xff]  ;;  %1302 = vst [vmem:[%s1827_s17 + $0xa38] sm:$0xff] %v902_v17  ;;  %v908_v29 = vmax.f32 %v508_v26, 0.0 }
  0xed   : > { %1303 = vst [vmem:[%s1827_s17 + $0xa40] sm:$0xff] %v903_v18  ;;  %1304 = vst [vmem:[%s1827_s17 + $0xa48] sm:$0xff] %v904_v19  ;;  %v909_v30 = vmax.f32 %v509_v27, 0.0  ;;  %v910_v31 = vmax.f32 %v510_v28, 0.0  ;;  %v511_v32 = vld [vmem:[%s1812_s12 + $0xa80] sm:$0xff]  ;;  %v512_v33 = vld [vmem:[%s1812_s12 + $0xa88] sm:$0xff] }
  0xee   : > { %v513_v34 = vld [vmem:[%s1812_s12 + $0xa90] sm:$0xff]  ;;  %1305 = vst [vmem:[%s1827_s17 + $0xa50] sm:$0xff] %v905_v23  ;;  %1306 = vst [vmem:[%s1827_s17 + $0xa58] sm:$0xff] %v906_v24  ;;  %v911_v35 = vmax.f32 %v511_v32, 0.0  ;;  %v912_v36 = vmax.f32 %v512_v33, 0.0  ;;  %v514_v38 = vld [vmem:[%s1812_s12 + $0xa98] sm:$0xff] }
  0xef   : > { %1307 = vst [vmem:[%s1827_s17 + $0xa60] sm:$0xff] %v907_v25  ;;  %v913_v37 = vmax.f32 %v513_v34, 0.0  ;;  %v515_v39 = vld [vmem:[%s1812_s12 + $0xaa0] sm:$0xff]  ;;  %v516_v40 = vld [vmem:[%s1812_s12 + $0xaa8] sm:$0xff]  ;;  %1308 = vst [vmem:[%s1827_s17 + $0xa68] sm:$0xff] %v908_v29  ;;  %v914_v41 = vmax.f32 %v514_v38, 0.0 }
  0xf0   : > { %1309 = vst [vmem:[%s1827_s17 + $0xa70] sm:$0xff] %v909_v30  ;;  %1310 = vst [vmem:[%s1827_s17 + $0xa78] sm:$0xff] %v910_v31  ;;  %v915_v42 = vmax.f32 %v515_v39, 0.0  ;;  %v916_v43 = vmax.f32 %v516_v40, 0.0  ;;  %v517_v44 = vld [vmem:[%s1812_s12 + $0xab0] sm:$0xff]  ;;  %v518_v45 = vld [vmem:[%s1812_s12 + $0xab8] sm:$0xff] }
  0xf1   : > { %v519_v46 = vld [vmem:[%s1812_s12 + $0xac0] sm:$0xff]  ;;  %1311 = vst [vmem:[%s1827_s17 + $0xa80] sm:$0xff] %v911_v35  ;;  %1312 = vst [vmem:[%s1827_s17 + $0xa88] sm:$0xff] %v912_v36  ;;  %v917_v47 = vmax.f32 %v517_v44, 0.0  ;;  %v918_v48 = vmax.f32 %v518_v45, 0.0  ;;  %v520_v50 = vld [vmem:[%s1812_s12 + $0xac8] sm:$0xff] }
  0xf2   : > { %1313 = vst [vmem:[%s1827_s17 + $0xa90] sm:$0xff] %v913_v37  ;;  %v919_v49 = vmax.f32 %v519_v46, 0.0  ;;  %v521_v51 = vld [vmem:[%s1812_s12 + $0xad0] sm:$0xff]  ;;  %v522_v52 = vld [vmem:[%s1812_s12 + $0xad8] sm:$0xff]  ;;  %1314 = vst [vmem:[%s1827_s17 + $0xa98] sm:$0xff] %v914_v41  ;;  %v920_v53 = vmax.f32 %v520_v50, 0.0 }
  0xf3   : > { %1315 = vst [vmem:[%s1827_s17 + $0xaa0] sm:$0xff] %v915_v42  ;;  %1316 = vst [vmem:[%s1827_s17 + $0xaa8] sm:$0xff] %v916_v43  ;;  %v921_v54 = vmax.f32 %v521_v51, 0.0  ;;  %v922_v55 = vmax.f32 %v522_v52, 0.0  ;;  %v523_v56 = vld [vmem:[%s1812_s12 + $0xae0] sm:$0xff]  ;;  %v524_v57 = vld [vmem:[%s1812_s12 + $0xae8] sm:$0xff] }
  0xf4   : > { %v525_v58 = vld [vmem:[%s1812_s12 + $0xaf0] sm:$0xff]  ;;  %1317 = vst [vmem:[%s1827_s17 + $0xab0] sm:$0xff] %v917_v47  ;;  %1318 = vst [vmem:[%s1827_s17 + $0xab8] sm:$0xff] %v918_v48  ;;  %v923_v59 = vmax.f32 %v523_v56, 0.0  ;;  %v924_v60 = vmax.f32 %v524_v57, 0.0  ;;  %v526_v62 = vld [vmem:[%s1812_s12 + $0xaf8] sm:$0xff] }
  0xf5   : > { %1319 = vst [vmem:[%s1827_s17 + $0xac0] sm:$0xff] %v919_v49  ;;  %v925_v61 = vmax.f32 %v525_v58, 0.0  ;;  %v527_v63 = vld [vmem:[%s1812_s12 + $0xb00] sm:$0xff]  ;;  %v528_v0 = vld [vmem:[%s1812_s12 + $0xb08] sm:$0xff]  ;;  %1320 = vst [vmem:[%s1827_s17 + $0xac8] sm:$0xff] %v920_v53  ;;  %v926_v1 = vmax.f32 %v526_v62, 0.0 }
  0xf6   : > { %1321 = vst [vmem:[%s1827_s17 + $0xad0] sm:$0xff] %v921_v54  ;;  %1322 = vst [vmem:[%s1827_s17 + $0xad8] sm:$0xff] %v922_v55  ;;  %v927_v2 = vmax.f32 %v527_v63, 0.0  ;;  %v928_v3 = vmax.f32 %v528_v0, 0.0  ;;  %v529_v4 = vld [vmem:[%s1812_s12 + $0xb10] sm:$0xff]  ;;  %v530_v5 = vld [vmem:[%s1812_s12 + $0xb18] sm:$0xff] }
  0xf7   : > { %v531_v6 = vld [vmem:[%s1812_s12 + $0xb20] sm:$0xff]  ;;  %1323 = vst [vmem:[%s1827_s17 + $0xae0] sm:$0xff] %v923_v59  ;;  %1324 = vst [vmem:[%s1827_s17 + $0xae8] sm:$0xff] %v924_v60  ;;  %v929_v7 = vmax.f32 %v529_v4, 0.0  ;;  %v930_v8 = vmax.f32 %v530_v5, 0.0  ;;  %v532_v10 = vld [vmem:[%s1812_s12 + $0xb28] sm:$0xff] }
  0xf8   : > { %1325 = vst [vmem:[%s1827_s17 + $0xaf0] sm:$0xff] %v925_v61  ;;  %v931_v9 = vmax.f32 %v531_v6, 0.0  ;;  %v533_v11 = vld [vmem:[%s1812_s12 + $0xb30] sm:$0xff]  ;;  %v534_v12 = vld [vmem:[%s1812_s12 + $0xb38] sm:$0xff]  ;;  %1326 = vst [vmem:[%s1827_s17 + $0xaf8] sm:$0xff] %v926_v1  ;;  %v932_v13 = vmax.f32 %v532_v10, 0.0 }
  0xf9   : > { %1327 = vst [vmem:[%s1827_s17 + $0xb00] sm:$0xff] %v927_v2  ;;  %1328 = vst [vmem:[%s1827_s17 + $0xb08] sm:$0xff] %v928_v3  ;;  %v933_v14 = vmax.f32 %v533_v11, 0.0  ;;  %v934_v15 = vmax.f32 %v534_v12, 0.0  ;;  %v535_v16 = vld [vmem:[%s1812_s12 + $0xb40] sm:$0xff]  ;;  %v536_v17 = vld [vmem:[%s1812_s12 + $0xb48] sm:$0xff] }
  0xfa   : > { %v537_v18 = vld [vmem:[%s1812_s12 + $0xb50] sm:$0xff]  ;;  %1329 = vst [vmem:[%s1827_s17 + $0xb10] sm:$0xff] %v929_v7  ;;  %1330 = vst [vmem:[%s1827_s17 + $0xb18] sm:$0xff] %v930_v8  ;;  %v935_v19 = vmax.f32 %v535_v16, 0.0  ;;  %v936_v20 = vmax.f32 %v536_v17, 0.0  ;;  %v538_v22 = vld [vmem:[%s1812_s12 + $0xb58] sm:$0xff] }
  0xfb   : > { %1331 = vst [vmem:[%s1827_s17 + $0xb20] sm:$0xff] %v931_v9  ;;  %v937_v21 = vmax.f32 %v537_v18, 0.0  ;;  %v539_v23 = vld [vmem:[%s1812_s12 + $0xb60] sm:$0xff]  ;;  %v540_v24 = vld [vmem:[%s1812_s12 + $0xb68] sm:$0xff]  ;;  %1332 = vst [vmem:[%s1827_s17 + $0xb28] sm:$0xff] %v932_v13  ;;  %v938_v25 = vmax.f32 %v538_v22, 0.0 }
  0xfc   : > { %1333 = vst [vmem:[%s1827_s17 + $0xb30] sm:$0xff] %v933_v14  ;;  %1334 = vst [vmem:[%s1827_s17 + $0xb38] sm:$0xff] %v934_v15  ;;  %v939_v26 = vmax.f32 %v539_v23, 0.0  ;;  %v940_v27 = vmax.f32 %v540_v24, 0.0  ;;  %v541_v28 = vld [vmem:[%s1812_s12 + $0xb70] sm:$0xff]  ;;  %v542_v29 = vld [vmem:[%s1812_s12 + $0xb78] sm:$0xff] }
  0xfd   : > { %v543_v30 = vld [vmem:[%s1812_s12 + $0xb80] sm:$0xff]  ;;  %1335 = vst [vmem:[%s1827_s17 + $0xb40] sm:$0xff] %v935_v19  ;;  %1336 = vst [vmem:[%s1827_s17 + $0xb48] sm:$0xff] %v936_v20  ;;  %v941_v31 = vmax.f32 %v541_v28, 0.0  ;;  %v942_v32 = vmax.f32 %v542_v29, 0.0  ;;  %v544_v34 = vld [vmem:[%s1812_s12 + $0xb88] sm:$0xff] }
  0xfe   : > { %1337 = vst [vmem:[%s1827_s17 + $0xb50] sm:$0xff] %v937_v21  ;;  %v943_v33 = vmax.f32 %v543_v30, 0.0  ;;  %v545_v35 = vld [vmem:[%s1812_s12 + $0xb90] sm:$0xff]  ;;  %v546_v36 = vld [vmem:[%s1812_s12 + $0xb98] sm:$0xff]  ;;  %1338 = vst [vmem:[%s1827_s17 + $0xb58] sm:$0xff] %v938_v25  ;;  %v944_v37 = vmax.f32 %v544_v34, 0.0 }
  0xff   : > { %1339 = vst [vmem:[%s1827_s17 + $0xb60] sm:$0xff] %v939_v26  ;;  %1340 = vst [vmem:[%s1827_s17 + $0xb68] sm:$0xff] %v940_v27  ;;  %v945_v38 = vmax.f32 %v545_v35, 0.0  ;;  %v946_v39 = vmax.f32 %v546_v36, 0.0  ;;  %v547_v40 = vld [vmem:[%s1812_s12 + $0xba0] sm:$0xff]  ;;  %v548_v41 = vld [vmem:[%s1812_s12 + $0xba8] sm:$0xff] }
 0x100   : > { %v549_v42 = vld [vmem:[%s1812_s12 + $0xbb0] sm:$0xff]  ;;  %1341 = vst [vmem:[%s1827_s17 + $0xb70] sm:$0xff] %v941_v31  ;;  %1342 = vst [vmem:[%s1827_s17 + $0xb78] sm:$0xff] %v942_v32  ;;  %v947_v43 = vmax.f32 %v547_v40, 0.0  ;;  %v948_v44 = vmax.f32 %v548_v41, 0.0  ;;  %v550_v46 = vld [vmem:[%s1812_s12 + $0xbb8] sm:$0xff] }
 0x101   : > { %1343 = vst [vmem:[%s1827_s17 + $0xb80] sm:$0xff] %v943_v33  ;;  %v949_v45 = vmax.f32 %v549_v42, 0.0  ;;  %v551_v47 = vld [vmem:[%s1812_s12 + $0xbc0] sm:$0xff]  ;;  %v552_v48 = vld [vmem:[%s1812_s12 + $0xbc8] sm:$0xff]  ;;  %1344 = vst [vmem:[%s1827_s17 + $0xb88] sm:$0xff] %v944_v37  ;;  %v950_v49 = vmax.f32 %v550_v46, 0.0 }
 0x102   : > { %1345 = vst [vmem:[%s1827_s17 + $0xb90] sm:$0xff] %v945_v38  ;;  %1346 = vst [vmem:[%s1827_s17 + $0xb98] sm:$0xff] %v946_v39  ;;  %v951_v50 = vmax.f32 %v551_v47, 0.0  ;;  %v952_v51 = vmax.f32 %v552_v48, 0.0  ;;  %v553_v52 = vld [vmem:[%s1812_s12 + $0xbd0] sm:$0xff]  ;;  %v554_v53 = vld [vmem:[%s1812_s12 + $0xbd8] sm:$0xff] }
 0x103   : > { %v555_v54 = vld [vmem:[%s1812_s12 + $0xbe0] sm:$0xff]  ;;  %1347 = vst [vmem:[%s1827_s17 + $0xba0] sm:$0xff] %v947_v43  ;;  %1348 = vst [vmem:[%s1827_s17 + $0xba8] sm:$0xff] %v948_v44  ;;  %v953_v55 = vmax.f32 %v553_v52, 0.0  ;;  %v954_v56 = vmax.f32 %v554_v53, 0.0  ;;  %v556_v58 = vld [vmem:[%s1812_s12 + $0xbe8] sm:$0xff] }
 0x104   : > { %1349 = vst [vmem:[%s1827_s17 + $0xbb0] sm:$0xff] %v949_v45  ;;  %v955_v57 = vmax.f32 %v555_v54, 0.0  ;;  %v557_v59 = vld [vmem:[%s1812_s12 + $0xbf0] sm:$0xff]  ;;  %v558_v60 = vld [vmem:[%s1812_s12 + $0xbf8] sm:$0xff]  ;;  %1350 = vst [vmem:[%s1827_s17 + $0xbb8] sm:$0xff] %v950_v49  ;;  %v956_v61 = vmax.f32 %v556_v58, 0.0 }
 0x105   : > { %1351 = vst [vmem:[%s1827_s17 + $0xbc0] sm:$0xff] %v951_v50  ;;  %1352 = vst [vmem:[%s1827_s17 + $0xbc8] sm:$0xff] %v952_v51  ;;  %v957_v62 = vmax.f32 %v557_v59, 0.0  ;;  %v958_v63 = vmax.f32 %v558_v60, 0.0  ;;  %v559_v0 = vld [vmem:[%s1812_s12 + $0xc00] sm:$0xff]  ;;  %v560_v1 = vld [vmem:[%s1812_s12 + $0xc08] sm:$0xff] }
 0x106   : > { %v561_v2 = vld [vmem:[%s1812_s12 + $0xc10] sm:$0xff]  ;;  %1353 = vst [vmem:[%s1827_s17 + $0xbd0] sm:$0xff] %v953_v55  ;;  %1354 = vst [vmem:[%s1827_s17 + $0xbd8] sm:$0xff] %v954_v56  ;;  %v959_v3 = vmax.f32 %v559_v0, 0.0  ;;  %v960_v4 = vmax.f32 %v560_v1, 0.0  ;;  %v562_v6 = vld [vmem:[%s1812_s12 + $0xc18] sm:$0xff] }
 0x107   : > { %1355 = vst [vmem:[%s1827_s17 + $0xbe0] sm:$0xff] %v955_v57  ;;  %v961_v5 = vmax.f32 %v561_v2, 0.0  ;;  %v563_v7 = vld [vmem:[%s1812_s12 + $0xc20] sm:$0xff]  ;;  %v564_v8 = vld [vmem:[%s1812_s12 + $0xc28] sm:$0xff]  ;;  %1356 = vst [vmem:[%s1827_s17 + $0xbe8] sm:$0xff] %v956_v61  ;;  %v962_v9 = vmax.f32 %v562_v6, 0.0 }
 0x108   : > { %1357 = vst [vmem:[%s1827_s17 + $0xbf0] sm:$0xff] %v957_v62  ;;  %1358 = vst [vmem:[%s1827_s17 + $0xbf8] sm:$0xff] %v958_v63  ;;  %v963_v10 = vmax.f32 %v563_v7, 0.0  ;;  %v964_v11 = vmax.f32 %v564_v8, 0.0  ;;  %v565_v12 = vld [vmem:[%s1812_s12 + $0xc30] sm:$0xff]  ;;  %v566_v13 = vld [vmem:[%s1812_s12 + $0xc38] sm:$0xff] }
 0x109   : > { %v567_v14 = vld [vmem:[%s1812_s12 + $0xc40] sm:$0xff]  ;;  %1359 = vst [vmem:[%s1827_s17 + $0xc00] sm:$0xff] %v959_v3  ;;  %1360 = vst [vmem:[%s1827_s17 + $0xc08] sm:$0xff] %v960_v4  ;;  %v965_v15 = vmax.f32 %v565_v12, 0.0  ;;  %v966_v16 = vmax.f32 %v566_v13, 0.0  ;;  %v568_v18 = vld [vmem:[%s1812_s12 + $0xc48] sm:$0xff] }
 0x10a   : > { %1361 = vst [vmem:[%s1827_s17 + $0xc10] sm:$0xff] %v961_v5  ;;  %v967_v17 = vmax.f32 %v567_v14, 0.0  ;;  %v569_v19 = vld [vmem:[%s1812_s12 + $0xc50] sm:$0xff]  ;;  %v570_v20 = vld [vmem:[%s1812_s12 + $0xc58] sm:$0xff]  ;;  %1362 = vst [vmem:[%s1827_s17 + $0xc18] sm:$0xff] %v962_v9  ;;  %v968_v21 = vmax.f32 %v568_v18, 0.0 }
 0x10b   : > { %1363 = vst [vmem:[%s1827_s17 + $0xc20] sm:$0xff] %v963_v10  ;;  %1364 = vst [vmem:[%s1827_s17 + $0xc28] sm:$0xff] %v964_v11  ;;  %v969_v22 = vmax.f32 %v569_v19, 0.0  ;;  %v970_v23 = vmax.f32 %v570_v20, 0.0  ;;  %v571_v24 = vld [vmem:[%s1812_s12 + $0xc60] sm:$0xff]  ;;  %v572_v25 = vld [vmem:[%s1812_s12 + $0xc68] sm:$0xff] }
 0x10c   : > { %v573_v26 = vld [vmem:[%s1812_s12 + $0xc70] sm:$0xff]  ;;  %1365 = vst [vmem:[%s1827_s17 + $0xc30] sm:$0xff] %v965_v15  ;;  %1366 = vst [vmem:[%s1827_s17 + $0xc38] sm:$0xff] %v966_v16  ;;  %v971_v27 = vmax.f32 %v571_v24, 0.0  ;;  %v972_v28 = vmax.f32 %v572_v25, 0.0  ;;  %v574_v30 = vld [vmem:[%s1812_s12 + $0xc78] sm:$0xff] }
 0x10d   : > { %1367 = vst [vmem:[%s1827_s17 + $0xc40] sm:$0xff] %v967_v17  ;;  %v973_v29 = vmax.f32 %v573_v26, 0.0  ;;  %1368 = vst [vmem:[%s1827_s17 + $0xc48] sm:$0xff] %v968_v21  ;;  %v974_v31 = vmax.f32 %v574_v30, 0.0  ;;  %1382 = sbr.rel (!%p1751_p9) target bundleno = 304 (0x130), region = 32  ;;  %s1385_s30 = ssub.s32 (%p1751_p9), 98, %s1383_s27 }
 0x10e   : > { %1369 = vst [vmem:[%s1827_s17 + $0xc50] sm:$0xff] %v969_v22  ;;  %1370 = vst [vmem:[%s1827_s17 + $0xc58] sm:$0xff] %v970_v23  ;;  %p1386_p8 = scmp.lt.s32.totalorder (%p1751_p9), %s1385_s30, 25 }
 0x10f   : > { %1371 = vst [vmem:[%s1827_s17 + $0xc60] sm:$0xff] %v971_v27  ;;  %1372 = vst [vmem:[%s1827_s17 + $0xc68] sm:$0xff] %v972_v28 }
 0x110   : > { %1373 = vst [vmem:[%s1827_s17 + $0xc70] sm:$0xff] %v973_v29  ;;  %1374 = vst [vmem:[%s1827_s17 + $0xc78] sm:$0xff] %v974_v31 }
 0x114   : > { %s2703_s30 = smov (!%p1386_p8, %s1385_s30), 25 }
 0x115   : > { %s2624_s4 = sshll.u32 %s2703_s30, 11 }
 0x116   : > { %s1391_s13 = ssub.s32 51200, %s2624_s4 }
 0x117   : > { %1392 = vsyncadd %s1376_s25, %s1391_s13  ;;  %p1500_p11 = scmp.ne.s32.totalorder %s2624_s4, 0  ;;  %s1514_s18 = smul.u32 51200, %s1678_s9 }
 0x118   : > { %s1399_s15 = sshll.u32 %s1827_s17, 4  ;;  %s1691_s24 = smov [#allocation5]   ;;  %s2637_s15 = int_to_ptr.vmem [resolvable:$true] %s1399_s15 }
 0x119   : > { %s2635_s22 = scalar_lea.hbm %s2688_s1, %s1514_s18  ;;  %s1604_s23 = scalar_lea.vmem %s2637_s15, %s2624_s4 }
 0x11a   : > { %p1605_p9 = scmp.ne.s32.totalorder %s2637_s15, %s1604_s23  ;;  %s1608_s26 = sshll.u32 %s1691_s24, 4  ;;  %s1609_s26 = int_to_ptr.vmem [resolvable:$false] %s1608_s26 }
 0x11b   : > { %s1610_s9 = scalar_lea.vmem %s1609_s26, 102400  ;;  %p1611_p13 = scmp.lt.s32.totalorder %s2637_s15, %s1609_s26 }
 0x11c   : > { %p1606_p0 = pnand %p1605_p9, %p1500_p11  ;;  %p1612_p1 = scmp.lt.s32.totalorder %s1610_s9, %s1604_s23 }
 0x11e   : > { %p1607_p12 = pneg %p1606_p0  ;;  %p1613_p2 = por %p1612_p1, %p1611_p13 }
 0x120   : > { %p1614_p4 = pnand %p1613_p2, %p1607_p12 }
 0x122   : > { %1617 = shalt.err (!%p1614_p4)
}
 0x123   : > { %s1618_s28 = scalar_lea.hbm %s2635_s22, %s2624_s4  ;;  %s1622_s5 = scalar_lea.hbm %s2688_s1, 200704 }
 0x124   : > { %p1619_p5 = scmp.ne.s32.totalorder %s2635_s22, %s1618_s28  ;;  %p1623_p7 = scmp.lt.u32.totalorder %s2635_s22, %s2688_s1 }
 0x125   : > { %p1624_p10 = scmp.lt.u32.totalorder %s1622_s5, %s1618_s28  ;;  %p1626_p9 = scmp.lt.u32.totalorder %s1618_s28, %s2635_s22 }
 0x126   : > { %p1620_p6 = pnand %p1619_p5, %p1500_p11 }
 0x127   : > { %p1625_p8 = por %p1624_p10, %p1623_p7 }
 0x128   : > { %p1621_p3 = pneg %p1620_p6 }
 0x129   : > { %p1627_p0 = por %p1626_p9, %p1625_p8 }
 0x12b   : > { %p1628_p12 = pnand %p1627_p0, %p1621_p3 }
 0x12d   : > { %1631 = shalt.err (!%p1628_p12)
}
 0x12e   : > { %s1692_s27 = smov 2048   ;;  %s1693_s30 = smov 128  }
 0x12f   : > { %1405 = dma.vmem_to_hbm [thread:$0]  (%p1500_p11), %s2637_s15, %s2624_s4, %s2635_s22, %s1376_s25, %s1692_s27, %s1692_s27, %s1693_s30  }
 0x130 PF: > { %p1523_p13 = scmp.ge.s32.totalorder %s1686_s11, 2  ;;  %s1414_s13 = sand.u32 1, %s1666_s6  }
 0x131   : > { %p2692_p1 = scmp.ne.s32.totalorder %s2691_s20, 0  ;;  %s1415_s18 = scalar_lea.sflag [#allocation4], %s1414_s13 }
 0x133   : > { %p1520_p2 = pnand %p1523_p13, %p2692_p1 }
 0x135   : > { %1661 = dma.done.wait (!%p1520_p2), %s1415_s18, 51200  }
 0x136   : > { %1663 = vsyncadd (!%p1520_p2), %s1415_s18, 4294916096  ;;  %s17_s11 = sadd.s32 1, %s1686_s11   ;;  %s2693_s6 = smov %s1670_s7 }
 0x137   : > { %p14_p4 = scmp.ge.s32.totalorder %s17_s11, 6   ;;  %s2694_s7 = smov %s1674_s8 }
 0x138   : > { %s2695_s8 = smov %s1756_s19  ;;  %s2696_s9 = smov %s1682_s10 }
 0x139   : > { %s2697_s10 = smov %s2699_s14  ;;  %16 = sbr.rel (!%p14_p4) target bundleno = 6 (0x6), region = 69 }
 0x140   :  { %1420 = vsyncpa [#allocation3], 1 }
 0x141   :  { %1422 = vsyncpa [#allocation3 + $0x1], 1 }
 0x142   :  { %1423 = vsyncpa [#allocation4], 1 }
 0x143   :  { %1425 = vsyncpa [#allocation4 + $0x1], 1 }

</bundles_post_ra>
